<compile_context>
chip_gen: v7x
topology: tpu7x:2x2x1
jax: 0.10.0
libtpu: 0.0.40
codegen_flags: <defaults>
</compile_context>

<pallas_src>
from functools import partial

import jax
import jax.numpy as jnp
from jax.experimental import pallas as pl
from jax.experimental.pallas import tpu as pltpu


def _round_up(x, n):
    return (x + n - 1) // n * n


# ---------------------------------------------------------------------------
# Fused GEMM (M tiles x K reduction) + affine + activation Pallas kernel
# ---------------------------------------------------------------------------

def _gemm_affine_kernel(x_ref, w_ref, s_ref, t_ref, o_ref, acc_ref, *, act):
    @pl.when(pl.program_id(1) == 0)
    def _():
        acc_ref[...] = jnp.zeros_like(acc_ref)

    acc_ref[...] += jnp.dot(x_ref[...], w_ref[...],
                            preferred_element_type=jnp.float32)

    @pl.when(pl.program_id(1) == pl.num_programs(1) - 1)
    def _():
        y = acc_ref[...] * s_ref[...] + t_ref[...]     # bias/BN folded
        if act == "relu":
            y = jnp.maximum(y, 0.0)
        elif act == "tanh":
            y = jnp.tanh(y)
        o_ref[...] = y.astype(o_ref.dtype)


def fused_matmul_affine(x, wmat, scale, shift, act, *, out_dtype=jnp.float32):
    """act(((M,K) @ (K,Co)) * scale + shift); scale/shift are (1, Co) f32."""
    m, k = x.shape
    co = wmat.shape[1]

    # Lane-dense output slab: 128 lanes, 256 when the real width already is.
    lane = 256 if co >= 256 else 128
    cop = _round_up(co, lane)
    if cop != co:
        wmat = jnp.pad(wmat, ((0, 0), (0, cop - co)))
        scale = jnp.pad(scale, ((0, 0), (0, cop - co)), constant_values=1.0)
        shift = jnp.pad(shift, ((0, 0), (0, cop - co)))

    # K reduction tiling (keeps every TPU generation inside the VMEM sweet
    # spot, incl. v7x's 64 MiB).  Untiled K equals the full array dim, so the
    # (8,128) block constraint is satisfied either way.
    if k > 512:
        nk = pl.cdiv(k, 512)
        tile_k = _round_up(pl.cdiv(k, nk), 128)
        kp = nk * tile_k
    else:
        nk, tile_k, kp = 1, k, k
    if kp != k:
        x = jnp.pad(x, ((0, 0), (0, kp - k)))
        wmat = jnp.pad(wmat, ((0, kp - k), (0, 0)))

    # M tiling: <=512 rows per tile, and >=2 grid steps whenever M allows it
    # so both v7x TensorCores get work on every layer.
    if m <= 8:
        nm, tile_m = 1, 8
    else:
        nm = max(2, pl.cdiv(m, 512))
        tile_m = _round_up(pl.cdiv(m, nm), 16)
    mp = nm * tile_m
    if mp != m:
        x = jnp.pad(x, ((0, mp - m), (0, 0)))

    out = pl.pallas_call(
        partial(_gemm_affine_kernel, act=act),
        out_shape=jax.ShapeDtypeStruct((mp, cop), out_dtype),
        grid_spec=pltpu.PrefetchScalarGridSpec(
            num_scalar_prefetch=0,
            grid=(nm, nk),
            in_specs=[
                pl.BlockSpec((tile_m, tile_k), lambda i, kk: (i, kk)),
                pl.BlockSpec((tile_k, cop), lambda i, kk: (kk, 0)),
                pl.BlockSpec((1, cop), lambda i, kk: (0, 0)),
                pl.BlockSpec((1, cop), lambda i, kk: (0, 0)),
            ],
            out_specs=pl.BlockSpec((tile_m, cop), lambda i, kk: (i, 0)),
            scratch_shapes=[pltpu.VMEM((tile_m, cop), jnp.float32)],
        ),
        compiler_params=pltpu.CompilerParams(
            dimension_semantics=("parallel", "arbitrary"),
            vmem_limit_bytes=32 * 1024 * 1024),
    )(x, wmat, scale, shift)
    return out[:m, :co]


# ---------------------------------------------------------------------------
# Residual 3x3, Co=1 conv: width-in-lanes VPU kernel (no Co lane padding)
# ---------------------------------------------------------------------------

def _res_conv_kernel(t_ref, w_ref, o_ref, *, n_in, ho, wo):
    acc = jnp.full((ho, wo), w_ref[n_in * 9], jnp.float32)       # conv bias
    for nn in range(n_in):
        plane = t_ref[0, nn]                                      # (ho+2, wo+2)
        for dh in range(3):
            for dw in range(3):
                acc = acc + plane[dh:dh + ho, dw:dw + wo] * w_ref[nn * 9 + dh * 3 + dw]
    o_ref[0] = acc


def residual_conv(out_nhwc, w, b):
    """Conv2d(in=batch, out=1, k=3, p=1) on out.permute(1,0,2,3) (torch)."""
    n, ho, wo, cout = out_nhwc.shape
    t = jnp.transpose(out_nhwc, (3, 0, 1, 2)).astype(jnp.float32)  # (Cout, N, Ho, Wo)
    tpad = jnp.pad(t, ((0, 0), (0, 0), (1, 1), (1, 1)))
    wflat = jnp.concatenate([w.reshape(-1), b.reshape(-1)]).astype(jnp.float32)
    return pl.pallas_call(
        partial(_res_conv_kernel, n_in=n, ho=ho, wo=wo),
        out_shape=jax.ShapeDtypeStruct((cout, ho, wo), jnp.float32),
        grid_spec=pltpu.PrefetchScalarGridSpec(
            num_scalar_prefetch=0,
            grid=(cout,),
            in_specs=[
                pl.BlockSpec((1, n, ho + 2, wo + 2), lambda c: (c, 0, 0, 0)),
                pl.BlockSpec(memory_space=pltpu.MemorySpace.SMEM),
            ],
            out_specs=pl.BlockSpec((1, ho, wo), lambda c: (c, 0, 0)),
        ),
        compiler_params=pltpu.CompilerParams(
            dimension_semantics=("parallel",)),
    )(tpad, wflat)


# ---------------------------------------------------------------------------
# Layer builders (wrapper-side layout plumbing; all FLOPs in pallas_call)
# ---------------------------------------------------------------------------

def _bn_affine(layer, eps=1e-5):
    """Fold conv bias + inference-mode BatchNorm into per-channel scale/shift."""
    s = layer["gamma"] / jnp.sqrt(layer["var"] + eps)
    t = layer["beta"] + (layer["b"] - layer["mean"]) * s
    return s.astype(jnp.float32), t.astype(jnp.float32)


def _im2col(xp, k):
    n, hp, wp, c = xp.shape
    ho, wo = hp - k + 1, wp - k + 1
    cols = [xp[:, i:i + ho, j:j + wo, :] for i in range(k) for j in range(k)]
    patches = jnp.concatenate(cols, axis=-1)
    return patches.reshape(n * ho * wo, k * k * c), (n, ho, wo)


def _deconv_s1(h, w, scale, shift, act, cdt, out_dtype):
    """ConvTranspose2d(k=4, s=1, p=0). Dense sub-pixel GEMM for 1x1 latents."""
    n, H, W, ci = h.shape
    _, co, K, _ = w.shape
    if H == 1 and W == 1:
        wm = jnp.transpose(w, (0, 2, 3, 1)).reshape(ci, K * K * co).astype(cdt)
        sc = jnp.tile(scale, K * K).reshape(1, -1)
        sh = jnp.tile(shift, K * K).reshape(1, -1)
        y = fused_matmul_affine(h.reshape(n, ci).astype(cdt), wm, sc, sh, act,
                                out_dtype=out_dtype)
        return y.reshape(n, K, K, co)
    # General spatial input: stride-1 deconv == stride-1 conv with flipped taps
    # (no zero insertion for stride 1, so a plain im2col GEMM is waste-free).
    wf = jnp.transpose(w[:, :, ::-1, ::-1], (2, 3, 0, 1)).reshape(K * K * ci, co)
    xp = jnp.pad(h, ((0, 0), (K - 1, K - 1), (K - 1, K - 1), (0, 0))).astype(cdt)
    patches, (n_, ho, wo) = _im2col(xp, K)
    y = fused_matmul_affine(patches, wf.astype(cdt), scale.reshape(1, -1),
                            shift.reshape(1, -1), act, out_dtype=out_dtype)
    return y.reshape(n_, ho, wo, co)


def _phase_wmat_s2(w):
    """ConvTranspose2d weight (Ci,Co,4,4), s=2, p=1 -> (2*2*Ci, 2*2*Co).
    Rows ordered (window tap dh, dw, ci); cols ordered (output phase a, b, co)."""
    ci, co, K, _ = w.shape
    assert K == 4
    blocks = []
    for dh in (0, 1):
        for dw in (0, 1):
            cols = []
            for a in (0, 1):
                for b in (0, 1):
                    cols.append(w[:, :, 3 - a - 2 * dh, 3 - b - 2 * dw])
            blocks.append(jnp.concatenate(cols, axis=1))          # (ci, 4*co)
    return jnp.concatenate(blocks, axis=0)                        # (4*ci, 4*co)


def _deconv_s2(h, w, scale, shift, act, cdt, out_dtype):
    """ConvTranspose2d(k=4, s=2, p=1) as a 4-phase sub-pixel GEMM (zero waste)."""
    n, H, W, ci = h.shape
    _, co, _, _ = w.shape
    xp = jnp.pad(h, ((0, 0), (1, 1), (1, 1), (0, 0))).astype(cdt)
    pats = jnp.concatenate(
        [xp[:, dh:dh + H + 1, dw:dw + W + 1, :] for dh in (0, 1) for dw in (0, 1)],
        axis=-1).reshape(n * (H + 1) * (W + 1), 4 * ci)
    wm = _phase_wmat_s2(w).astype(cdt)
    sc = jnp.tile(scale, 4).reshape(1, -1)
    sh = jnp.tile(shift, 4).reshape(1, -1)
    y = fused_matmul_affine(pats, wm, sc, sh, act, out_dtype=out_dtype)
    y = y.reshape(n, H + 1, W + 1, 2, 2, co)
    # Depth-to-space: output pixel (2m+a, 2p+b) <- phase (a,b) at window (m+a, p+b).
    out = jnp.zeros((n, 2 * H, 2 * W, co), y.dtype)
    for a in (0, 1):
        for b in (0, 1):
            out = out.at[:, a::2, b::2, :].set(y[:, a:a + H, b:b + W, a, b, :])
    return out


def _deconv_out_s8(h, w, bias, cdt):
    """Output ConvTranspose2d(k=4, s=8, p=14) + tanh. stride>kernel => no overlap,
    so bias+tanh fuse into the GEMM epilogue; uncovered pixels are tanh(bias)."""
    n, H, W, ci = h.shape
    _, co, K, _ = w.shape
    s, p = 8, 14
    ho, wo = (H - 1) * s - 2 * p + K, (W - 1) * s - 2 * p + K
    wm = jnp.transpose(w, (0, 2, 3, 1)).reshape(ci, K * K * co).astype(cdt)
    sc = jnp.ones((1, K * K * co), jnp.float32)
    sh = jnp.tile(bias.astype(jnp.float32), K * K).reshape(1, -1)
    y = fused_matmul_affine(h.reshape(n * H * W, ci).astype(cdt), wm, sc, sh,
                            "tanh", out_dtype=jnp.float32)
    y = y.reshape(n, H, W, K, K, co)
    fill = jnp.tanh(bias.astype(jnp.float32))
    canvas = jnp.broadcast_to(fill, (n, H, s, W, s, co))
    canvas = canvas.at[:, :, :K, :, :K, :].set(jnp.transpose(y, (0, 1, 3, 2, 4, 5)))
    canvas = canvas.reshape(n, H * s, W * s, co)
    return canvas[:, p:p + ho, p:p + wo, :]


# ---------------------------------------------------------------------------
# Generator224 forward
# ---------------------------------------------------------------------------

def generator224_forward(x, params, *, compute_dtype=None):
    """x: (batch, input_dim, H, W) NCHW (PyTorch layout)."""
    cdt = jnp.float32 if compute_dtype is None else compute_dtype
    h = jnp.transpose(x, (0, 2, 3, 1))                            # NHWC
    for i, layer in enumerate(params["hidden"]):
        s, t = _bn_affine(layer)
        if i == 0:
            h = _deconv_s1(h, layer["w"], s, t, "relu", cdt, out_dtype=cdt)
        else:
            h = _deconv_s2(h, layer["w"], s, t, "relu", cdt, out_dtype=cdt)
    out = _deconv_out_s8(h, params["out"]["w"], params["out"]["b"], cdt)
    # torch: out.permute(1,0,2,3) -> Conv2d(in=batch, out=1) -> permute back.
    adv = residual_conv(out, params["res"]["w"], params["res"]["b"])
    return adv[None]                                              # (1, out_dim, Ho, Wo)


def init_params(key, input_dim, num_filters, output_dim, batch_size,
                dtype=jnp.float32):
    """Matches the torch init: weights ~ N(0, 0.02), biases 0, BN defaults."""
    keys = jax.random.split(key, len(num_filters) + 2)
    hidden, ci = [], input_dim
    for i, co in enumerate(num_filters):
        w = 0.02 * jax.random.normal(keys[i], (ci, co, 4, 4), dtype)
        hidden.append(dict(w=w, b=jnp.zeros((co,), dtype),
                           gamma=jnp.ones((co,), dtype), beta=jnp.zeros((co,), dtype),
                           mean=jnp.zeros((co,), dtype), var=jnp.ones((co,), dtype)))
        ci = co
    w_out = 0.02 * jax.random.normal(keys[-2], (ci, output_dim, 4, 4), dtype)
    w_res = 0.02 * jax.random.normal(keys[-1], (1, batch_size, 3, 3), dtype)
    return dict(hidden=hidden,
                out=dict(w=w_out, b=jnp.zeros((output_dim,), dtype)),
                res=dict(w=w_res, b=jnp.zeros((1,), dtype)))


# ---------------------------------------------------------------------------
# Pure-JAX reference (independent ConvTranspose2d math) for validation
# ---------------------------------------------------------------------------

def _deconv_ref(x, w, b, stride, padding):
    n, ci, h, wdim = x.shape
    _, co, k, _ = w.shape
    ho = (h - 1) * stride - 2 * padding + k
    wo = (wdim - 1) * stride - 2 * padding + k
    y = jnp.einsum("nchw,cokl->nohwkl", x, w, precision=jax.lax.Precision.HIGHEST)
    out = jnp.zeros((n, co, ho + 2 * padding, wo + 2 * padding), x.dtype)
    for kh in range(k):
        for kw in range(k):
            out = out.at[:, :, kh:kh + (h - 1) * stride + 1:stride,
                               kw:kw + (wdim - 1) * stride + 1:stride].add(
                                   y[:, :, :, :, kh, kw])
    out = out[:, :, padding:padding + ho, padding:padding + wo]
    return out + b.reshape(1, -1, 1, 1)


def reference_forward(x, params, eps=1e-5):
    h = x.astype(jnp.float32)
    for i, layer in enumerate(params["hidden"]):
        stride, padding = (1, 0) if i == 0 else (2, 1)
        h = _deconv_ref(h, layer["w"], layer["b"], stride, padding)
        s = layer["gamma"] / jnp.sqrt(layer["var"] + eps)
        t = layer["beta"] - layer["mean"] * s
        h = jnp.maximum(h * s.reshape(1, -1, 1, 1) + t.reshape(1, -1, 1, 1), 0.0)
    o = jnp.tanh(_deconv_ref(h, params["out"]["w"], params["out"]["b"], 8, 14))
    o_ = jnp.transpose(o, (1, 0, 2, 3))
    adv = jax.lax.conv_general_dilated(
        o_, params["res"]["w"], (1, 1), ((1, 1), (1, 1)),
        dimension_numbers=("NCHW", "OIHW", "NCHW"),
        precision=jax.lax.Precision.HIGHEST)
    adv = adv + params["res"]["b"].reshape(1, -1, 1, 1)
    return jnp.transpose(adv, (1, 0, 2, 3))


# ---------------------------------------------------------------------------

if __name__ == "__main__":
    INPUT_DIM, NUM_FILTERS, OUTPUT_DIM, BATCH = 4, [8, 8], 3, 2
    key = jax.random.PRNGKey(0)
    kx, kx2, kp = jax.random.split(key, 3)
    params = init_params(kp, INPUT_DIM, NUM_FILTERS, OUTPUT_DIM, BATCH)

    # -- standalone check of the tiled GEMM kernel (exercises the K-reduction
    #    grid axis, M tiling, and lane/sublane padding paths) ---------------
    ka, kb = jax.random.split(jax.random.PRNGKey(1))
    A = jax.random.normal(ka, (300, 1500), jnp.float32)
    B = 0.02 * jax.random.normal(kb, (1500, 200), jnp.float32)
    sc = jnp.linspace(0.5, 1.5, 200).reshape(1, -1)
    sh = jnp.linspace(-1.0, 1.0, 200).reshape(1, -1)
    gemm_fn = jax.jit(lambda a, b, s_, t_: fused_matmul_affine(a, b, s_, t_, "relu"))
    got = jax.block_until_ready(gemm_fn(A, B, sc, sh))
    want = jnp.maximum(
        jnp.dot(A, B, precision=jax.lax.Precision.HIGHEST) * sc + sh, 0.0)
    gscale = float(jnp.max(jnp.abs(want))) + 1e-12
    gerr = float(jnp.max(jnp.abs(got - want)))
    assert gerr <= 2e-3 * gscale + 1e-5, (gerr, gscale)

    # -- 1x1 latent (standard DCGAN use): 1x1 -> 4x4 -> 8x8 -> 32x32 --------
    x = jax.random.normal(kx, (BATCH, INPUT_DIM, 1, 1), jnp.float32)
    ref = reference_forward(x, params)
    fwd = jax.jit(generator224_forward)
    out = jax.block_until_ready(fwd(x, params))
    assert out.shape == (1, OUTPUT_DIM, 32, 32), out.shape
    scale = float(jnp.max(jnp.abs(ref))) + 1e-12
    err = float(jnp.max(jnp.abs(out - ref)))
    assert err <= 2e-2 * scale + 1e-6, (err, scale)

    # -- spatial latent (exercises the general stride-1 first-layer path) ---
    x2 = jax.random.normal(kx2, (BATCH, INPUT_DIM, 2, 2), jnp.float32)
    ref2 = reference_forward(x2, params)
    out2 = jax.block_until_ready(fwd(x2, params))
    assert out2.shape == ref2.shape == (1, OUTPUT_DIM, 48, 48), (out2.shape, ref2.shape)
    scale2 = float(jnp.max(jnp.abs(ref2))) + 1e-12
    err2 = float(jnp.max(jnp.abs(out2 - ref2)))
    assert err2 <= 2e-2 * scale2 + 1e-6, (err2, scale2)

    # -- bf16 matmul operands / bf16 inter-layer activations (all TPU gens,
    #    incl. v5e); MXU accumulation and the affine/act epilogue stay f32 ---
    fwd_bf16 = jax.jit(partial(generator224_forward, compute_dtype=jnp.bfloat16))
    out_bf16 = jax.block_until_ready(fwd_bf16(x, params))
    err_bf16 = float(jnp.max(jnp.abs(out_bf16 - ref)))
    assert err_bf16 <= 1e-1 * scale + 1e-6, (err_bf16, scale)

    print("KERNEL_OK")
</pallas_src>

<mosaic_0001>
module attributes {stable_mosaic.version = 11 : i64} {
  func.func @_gemm_affine_kernel(%arg0: i32, %arg1: i32, %arg2: memref<160x512xf32, #tpu.memory_space<vmem>>, %arg3: memref<512x256xf32, #tpu.memory_space<vmem>>, %arg4: memref<1x256xf32, #tpu.memory_space<vmem>>, %arg5: memref<1x256xf32, #tpu.memory_space<vmem>>, %arg6: memref<160x256xf32, #tpu.memory_space<vmem>>, %arg7: memref<160x256xf32, #tpu.memory_space<vmem>>) attributes {dimension_semantics = [#tpu.dimension_semantics<parallel>, #tpu.dimension_semantics<arbitrary>], iteration_bounds = array<i64: 2, 3>, scalar_prefetch = 0 : i64, scratch_operands = 1 : i64, tpu.core_type = #tpu.core_type<tc>, window_params = [{transform_indices = @transform_0, window_bounds = array<i64: 160, 512>}, {transform_indices = @transform_1, window_bounds = array<i64: 512, 256>}, {pipeline_mode = #tpu.pipeline_mode<synchronous>, transform_indices = @transform_2, window_bounds = array<i64: 1, 256>}, {pipeline_mode = #tpu.pipeline_mode<synchronous>, transform_indices = @transform_3, window_bounds = array<i64: 1, 256>}, {transform_indices = @transform_4, window_bounds = array<i64: 160, 256>}]} {
    %c0_i32 = arith.constant 0 : i32
    %0 = arith.cmpi eq, %arg1, %c0_i32 : i32
    %1 = arith.extui %0 : i1 to i32
    %c0_i32_0 = arith.constant 0 : i32
    %2 = arith.cmpi ne, %1, %c0_i32_0 : i32
    scf.if %2 {
      %cst_9 = arith.constant 0.000000e+00 : f32
      %12 = vector.broadcast %cst_9 : f32 to vector<160x256xf32>
      %c0_10 = arith.constant 0 : index
      %c0_11 = arith.constant 0 : index
      %13 = vector.load %arg7[%c0_10, %c0_11] : memref<160x256xf32, #tpu.memory_space<vmem>>, vector<160x256xf32>
      tpu.vector_store %arg7[%c0_10, %c0_11], %12 {strides = array<i32>} : memref<160x256xf32, #tpu.memory_space<vmem>>, vector<160x256xf32>,
    } else {
    }
    %c0 = arith.constant 0 : index
    %c0_1 = arith.constant 0 : index
    %3 = vector.load %arg7[%c0, %c0_1] : memref<160x256xf32, #tpu.memory_space<vmem>>, vector<160x256xf32>
    %c0_2 = arith.constant 0 : index
    %c0_3 = arith.constant 0 : index
    %4 = vector.load %arg2[%c0_2, %c0_3] : memref<160x512xf32, #tpu.memory_space<vmem>>, vector<160x512xf32>
    %c0_4 = arith.constant 0 : index
    %c0_5 = arith.constant 0 : index
    %5 = vector.load %arg3[%c0_4, %c0_5] : memref<512x256xf32, #tpu.memory_space<vmem>>, vector<512x256xf32>
    %cst = arith.constant dense<0.000000e+00> : vector<160x256xf32>
    %6 = tpu.matmul %4, %5, %cst {dimension_numbers = #tpu.dot_dimension_numbers<[1], [0], [0], [1], [0, 0, 1, 1], [], []>} : vector<160x512xf32>, vector<512x256xf32>, vector<160x256xf32> -> vector<160x256xf32>
    %7 = arith.addf %3, %6 : vector<160x256xf32>
    %c0_6 = arith.constant 0 : index
    %c0_7 = arith.constant 0 : index
    %8 = vector.load %arg7[%c0_6, %c0_7] : memref<160x256xf32, #tpu.memory_space<vmem>>, vector<160x256xf32>
    tpu.vector_store %arg7[%c0_6, %c0_7], %7 {strides = array<i32>} : memref<160x256xf32, #tpu.memory_space<vmem>>, vector<160x256xf32>,
    %c2_i32 = arith.constant 2 : i32
    %9 = arith.cmpi eq, %arg1, %c2_i32 : i32
    %10 = arith.extui %9 : i1 to i32
    %c0_i32_8 = arith.constant 0 : i32
    %11 = arith.cmpi ne, %10, %c0_i32_8 : i32
    scf.if %11 {
      %c0_9 = arith.constant 0 : index
      %c0_10 = arith.constant 0 : index
      %12 = vector.load %arg7[%c0_9, %c0_10] : memref<160x256xf32, #tpu.memory_space<vmem>>, vector<160x256xf32>
      %c0_11 = arith.constant 0 : index
      %c0_12 = arith.constant 0 : index
      %13 = vector.load %arg4[%c0_11, %c0_12] : memref<1x256xf32, #tpu.memory_space<vmem>>, vector<1x256xf32>
      %14 = vector.broadcast %13 : vector<1x256xf32> to vector<160x256xf32>
      %15 = arith.mulf %12, %14 : vector<160x256xf32>
      %c0_13 = arith.constant 0 : index
      %c0_14 = arith.constant 0 : index
      %16 = vector.load %arg5[%c0_13, %c0_14] : memref<1x256xf32, #tpu.memory_space<vmem>>, vector<1x256xf32>
      %17 = vector.broadcast %16 : vector<1x256xf32> to vector<160x256xf32>
      %18 = arith.addf %15, %17 : vector<160x256xf32>
      %cst_15 = arith.constant 0.000000e+00 : f32
      %19 = vector.broadcast %cst_15 : f32 to vector<160x256xf32>
      %20 = arith.maximumf %18, %19 : vector<160x256xf32>
      %c0_16 = arith.constant 0 : index
      %c0_17 = arith.constant 0 : index
      %21 = vector.load %arg6[%c0_16, %c0_17] : memref<160x256xf32, #tpu.memory_space<vmem>>, vector<160x256xf32>
      tpu.vector_store %arg6[%c0_16, %c0_17], %20 {strides = array<i32>} : memref<160x256xf32, #tpu.memory_space<vmem>>, vector<160x256xf32>,
    } else {
    }
    return
  }
  func.func @transform_0(%arg0: i32, %arg1: i32) -> (i32, i32) {
    %c0_i32 = arith.constant 0 : i32
    return %arg0, %arg1 : i32, i32
  }
  func.func @transform_1(%arg0: i32, %arg1: i32) -> (i32, i32) {
    %c0_i32 = arith.constant 0 : i32
    %c0_i32_0 = arith.constant 0 : i32
    return %arg1, %c0_i32 : i32, i32
  }
  func.func @transform_2(%arg0: i32, %arg1: i32) -> (i32, i32) {
    %c0_i32 = arith.constant 0 : i32
    %c0_i32_0 = arith.constant 0 : i32
    %c0_i32_1 = arith.constant 0 : i32
    return %c0_i32, %c0_i32_0 : i32, i32
  }
  func.func @transform_3(%arg0: i32, %arg1: i32) -> (i32, i32) {
    %c0_i32 = arith.constant 0 : i32
    %c0_i32_0 = arith.constant 0 : i32
    %c0_i32_1 = arith.constant 0 : i32
    return %c0_i32, %c0_i32_0 : i32, i32
  }
  func.func @transform_4(%arg0: i32, %arg1: i32) -> (i32, i32) {
    %c0_i32 = arith.constant 0 : i32
    %c0_i32_0 = arith.constant 0 : i32
    return %arg0, %c0_i32 : i32, i32
  }
}

</mosaic_0001>

<bundles_post_ra>
// kernel: _lambda_.1
= control target key start
LH: loop header
LB: loop body
LE: loop exit
PB: predicated region body
PF: predicated region fallthrough
CT: control target
= control target key end

     0   :  { %s1813_s15 = smov 0   ;;  %s1815_s16 = smov 0   ;;  %s2419_s0 = inlined_call_operand.vmem [shape: f32[320,1536], index: 0, kind: input, shape index: {}]   ;;  %s2420_s1 = inlined_call_operand.vmem [shape: f32[1536,256], index: 1, kind: input, shape index: {}]   ;;  %s2421_s2 = inlined_call_operand.vmem [shape: f32[1,256], index: 2, kind: input, shape index: {}]   ;;  %s2422_s3 = inlined_call_operand.vmem [shape: f32[1,256], index: 3, kind: input, shape index: {}]   ;;  %s2423_s4 = inlined_call_operand.vmem [shape: f32[320,256], index: 4, kind: output, shape index: {}]  }
   0x1   :  { %s1817_s17 = smov 0   ;;  %s1819_s18 = smov 0  }
   0x2   :  { %s1821_s19 = smov 0   ;;  %s1823_s20 = smov 0  }
   0x3   :  { %s1825_s21 = smov 0  }
   0x4 LB: > { %s23_s22 = sadd.s32 1, %s1777_s19  ;;  %s26_s23 = sadd.s32 1, %s1781_s20  ;;  %s1785_s21 = sphi %s1825_s21, %s14_s21   ;;  %s1781_s20 = sphi %s1823_s20, %s2429_s20   ;;  %s1777_s19 = sphi %s1821_s19, %s2428_s19   ;;  %s1773_s18 = sphi %s1819_s18, %s2427_s18   ;;  %s1769_s17 = sphi %s1817_s17, %s2426_s17   ;;  %s1765_s16 = sphi %s1815_s16, %s2425_s16   ;;  %s1761_s15 = sphi %s1813_s15, %s2424_s15  }
   0x5   : > { %p24_p0 = scmp.ge.s32.totalorder %s23_s22, 3  ;;  %p42_p1 = scmp.ne.s32.totalorder %s1765_s16, %s1761_s15 }
   0x6   : > { %p43_p2 = scmp.eq.s32.totalorder %s1785_s21, 0  ;;  %s35_s27 = sadd.s32 1, %s1765_s16 }
   0x7   : > { %s2431_s22 = smov (%p24_p0, %s23_s22), 0  ;;  %s2433_s23 = smov (!%p24_p0, %s26_s23), %s1781_s20 }
   0x8   : > { %p44_p3 = por %p43_p2, %p42_p1  ;;  %p28_p4 = scmp.ge.s32.totalorder %s2433_s23, 2 }
   0x9   : > { %s31_s24 = ssub.s32 %s1777_s19, %s2431_s22  ;;  %p1487_p6 = scmp.ge.s32.totalorder %s1785_s21, 6 }
   0xa   : > { %s2435_s23 = smov (%p28_p4, %s2433_s23), 0 }
   0xb   : > { %s30_s25 = ssub.s32 %s1781_s20, %s2435_s23  ;;  %168 = sbr.rel (%p1487_p6) target bundleno = 66 (0x42), region = 24 }
   0xc   : > { %s32_s26 = sor.u32 %s31_s24, %s30_s25 }
   0xd   : > { %p33_p5 = scmp.eq.s32.totalorder %s32_s26, 0 }
   0xf   : > { %s1864_s28 = scalar_select %p33_p5, %s1765_s16, %s35_s27  }
  0x12   : > { %171 = sbr.rel (!%p44_p3) target bundleno = 66 (0x42), region = 28  ;;  %s173_s29 = sand.u32 (%p44_p3), 1, %s1765_s16  }
  0x13   : > { %s1670_s30 = smul.u32 (%p44_p3), 640, %s173_s29  ;;  %s1488_s5 = sshll.u32 (%p44_p3), %s1777_s19, 2 }
  0x14   : > { %s1673_s6 = smul.u32 (%p44_p3), 240, %s1781_s20 }
  0x15   : > { %s1878_s12 = scalar_lea.vmem (%p44_p3), [#allocation3], %s1670_s30 }
  0x16   : > { %s179_s7 = sadd.s32 (%p44_p3), %s1673_s6, %s1488_s5 }
  0x17   : > { %s1489_s8 = sshll.u32 (%p44_p3), %s179_s7, 3 }
  0x18   : > { %s1873_s11 = scalar_lea.vmem (%p44_p3), %s2419_s0, %s1489_s8 }
  0x19   : > { %v194_v0 = vld [vmem:[%s1873_s11] sm:$0xff]  ;;  %v196_v1 = vld [vmem:[%s1873_s11 + $0x8] sm:$0xff]  ;;  %v198_v2 = vld [vmem:[%s1873_s11 + $0x10] sm:$0xff] }
  0x1a   : > { %195 = vst [vmem:[%s1878_s12] sm:$0xff] %v194_v0  ;;  %197 = vst [vmem:[%s1878_s12 + $0x8] sm:$0xff] %v196_v1  ;;  %v200_v3 = vld [vmem:[%s1873_s11 + $0x18] sm:$0xff]  ;;  %v202_v4 = vld [vmem:[%s1873_s11 + $0x60] sm:$0xff] }
  0x1b   : > { %199 = vst [vmem:[%s1878_s12 + $0x10] sm:$0xff] %v198_v2  ;;  %v204_v5 = vld [vmem:[%s1873_s11 + $0x68] sm:$0xff]  ;;  %201 = vst [vmem:[%s1878_s12 + $0x18] sm:$0xff] %v200_v3  ;;  %v206_v6 = vld [vmem:[%s1873_s11 + $0x70] sm:$0xff] }
  0x1c   : > { %203 = vst [vmem:[%s1878_s12 + $0x20] sm:$0xff] %v202_v4  ;;  %205 = vst [vmem:[%s1878_s12 + $0x28] sm:$0xff] %v204_v5  ;;  %v208_v7 = vld [vmem:[%s1873_s11 + $0x78] sm:$0xff]  ;;  %v210_v8 = vld [vmem:[%s1873_s11 + $0xc0] sm:$0xff] }
  0x1d   : > { %207 = vst [vmem:[%s1878_s12 + $0x30] sm:$0xff] %v206_v6  ;;  %209 = vst [vmem:[%s1878_s12 + $0x38] sm:$0xff] %v208_v7  ;;  %v212_v9 = vld [vmem:[%s1873_s11 + $0xc8] sm:$0xff]  ;;  %v214_v10 = vld [vmem:[%s1873_s11 + $0xd0] sm:$0xff] }
  0x1e   : > { %211 = vst [vmem:[%s1878_s12 + $0x40] sm:$0xff] %v210_v8  ;;  %v216_v11 = vld [vmem:[%s1873_s11 + $0xd8] sm:$0xff]  ;;  %213 = vst [vmem:[%s1878_s12 + $0x48] sm:$0xff] %v212_v9  ;;  %v218_v12 = vld [vmem:[%s1873_s11 + $0x120] sm:$0xff] }
  0x1f   : > { %215 = vst [vmem:[%s1878_s12 + $0x50] sm:$0xff] %v214_v10  ;;  %217 = vst [vmem:[%s1878_s12 + $0x58] sm:$0xff] %v216_v11  ;;  %v220_v13 = vld [vmem:[%s1873_s11 + $0x128] sm:$0xff]  ;;  %v222_v14 = vld [vmem:[%s1873_s11 + $0x130] sm:$0xff] }
  0x20   : > { %219 = vst [vmem:[%s1878_s12 + $0x60] sm:$0xff] %v218_v12  ;;  %221 = vst [vmem:[%s1878_s12 + $0x68] sm:$0xff] %v220_v13  ;;  %v224_v15 = vld [vmem:[%s1873_s11 + $0x138] sm:$0xff]  ;;  %v226_v16 = vld [vmem:[%s1873_s11 + $0x180] sm:$0xff] }
  0x21   : > { %223 = vst [vmem:[%s1878_s12 + $0x70] sm:$0xff] %v222_v14  ;;  %v228_v17 = vld [vmem:[%s1873_s11 + $0x188] sm:$0xff]  ;;  %225 = vst [vmem:[%s1878_s12 + $0x78] sm:$0xff] %v224_v15  ;;  %v230_v18 = vld [vmem:[%s1873_s11 + $0x190] sm:$0xff] }
  0x22   : > { %227 = vst [vmem:[%s1878_s12 + $0x80] sm:$0xff] %v226_v16  ;;  %229 = vst [vmem:[%s1878_s12 + $0x88] sm:$0xff] %v228_v17  ;;  %v232_v19 = vld [vmem:[%s1873_s11 + $0x198] sm:$0xff]  ;;  %v234_v20 = vld [vmem:[%s1873_s11 + $0x1e0] sm:$0xff] }
  0x23   : > { %231 = vst [vmem:[%s1878_s12 + $0x90] sm:$0xff] %v230_v18  ;;  %233 = vst [vmem:[%s1878_s12 + $0x98] sm:$0xff] %v232_v19  ;;  %v236_v21 = vld [vmem:[%s1873_s11 + $0x1e8] sm:$0xff]  ;;  %v238_v22 = vld [vmem:[%s1873_s11 + $0x1f0] sm:$0xff] }
  0x24   : > { %235 = vst [vmem:[%s1878_s12 + $0xa0] sm:$0xff] %v234_v20  ;;  %v240_v23 = vld [vmem:[%s1873_s11 + $0x1f8] sm:$0xff]  ;;  %237 = vst [vmem:[%s1878_s12 + $0xa8] sm:$0xff] %v236_v21  ;;  %v242_v24 = vld [vmem:[%s1873_s11 + $0x240] sm:$0xff] }
  0x25   : > { %239 = vst [vmem:[%s1878_s12 + $0xb0] sm:$0xff] %v238_v22  ;;  %241 = vst [vmem:[%s1878_s12 + $0xb8] sm:$0xff] %v240_v23  ;;  %v244_v25 = vld [vmem:[%s1873_s11 + $0x248] sm:$0xff]  ;;  %v246_v26 = vld [vmem:[%s1873_s11 + $0x250] sm:$0xff] }
  0x26   : > { %243 = vst [vmem:[%s1878_s12 + $0xc0] sm:$0xff] %v242_v24  ;;  %245 = vst [vmem:[%s1878_s12 + $0xc8] sm:$0xff] %v244_v25  ;;  %v248_v27 = vld [vmem:[%s1873_s11 + $0x258] sm:$0xff]  ;;  %v250_v28 = vld [vmem:[%s1873_s11 + $0x2a0] sm:$0xff] }
  0x27   : > { %247 = vst [vmem:[%s1878_s12 + $0xd0] sm:$0xff] %v246_v26  ;;  %v252_v29 = vld [vmem:[%s1873_s11 + $0x2a8] sm:$0xff]  ;;  %249 = vst [vmem:[%s1878_s12 + $0xd8] sm:$0xff] %v248_v27  ;;  %v254_v30 = vld [vmem:[%s1873_s11 + $0x2b0] sm:$0xff] }
  0x28   : > { %251 = vst [vmem:[%s1878_s12 + $0xe0] sm:$0xff] %v250_v28  ;;  %253 = vst [vmem:[%s1878_s12 + $0xe8] sm:$0xff] %v252_v29  ;;  %v256_v31 = vld [vmem:[%s1873_s11 + $0x2b8] sm:$0xff]  ;;  %v258_v32 = vld [vmem:[%s1873_s11 + $0x300] sm:$0xff] }
  0x29   : > { %255 = vst [vmem:[%s1878_s12 + $0xf0] sm:$0xff] %v254_v30  ;;  %257 = vst [vmem:[%s1878_s12 + $0xf8] sm:$0xff] %v256_v31  ;;  %v260_v33 = vld [vmem:[%s1873_s11 + $0x308] sm:$0xff]  ;;  %v262_v34 = vld [vmem:[%s1873_s11 + $0x310] sm:$0xff] }
  0x2a   : > { %259 = vst [vmem:[%s1878_s12 + $0x100] sm:$0xff] %v258_v32  ;;  %v264_v35 = vld [vmem:[%s1873_s11 + $0x318] sm:$0xff]  ;;  %261 = vst [vmem:[%s1878_s12 + $0x108] sm:$0xff] %v260_v33  ;;  %v266_v36 = vld [vmem:[%s1873_s11 + $0x360] sm:$0xff] }
  0x2b   : > { %263 = vst [vmem:[%s1878_s12 + $0x110] sm:$0xff] %v262_v34  ;;  %265 = vst [vmem:[%s1878_s12 + $0x118] sm:$0xff] %v264_v35  ;;  %v268_v37 = vld [vmem:[%s1873_s11 + $0x368] sm:$0xff]  ;;  %v270_v38 = vld [vmem:[%s1873_s11 + $0x370] sm:$0xff] }
  0x2c   : > { %267 = vst [vmem:[%s1878_s12 + $0x120] sm:$0xff] %v266_v36  ;;  %269 = vst [vmem:[%s1878_s12 + $0x128] sm:$0xff] %v268_v37  ;;  %v272_v39 = vld [vmem:[%s1873_s11 + $0x378] sm:$0xff]  ;;  %v274_v40 = vld [vmem:[%s1873_s11 + $0x3c0] sm:$0xff] }
  0x2d   : > { %271 = vst [vmem:[%s1878_s12 + $0x130] sm:$0xff] %v270_v38  ;;  %v276_v41 = vld [vmem:[%s1873_s11 + $0x3c8] sm:$0xff]  ;;  %273 = vst [vmem:[%s1878_s12 + $0x138] sm:$0xff] %v272_v39  ;;  %v278_v42 = vld [vmem:[%s1873_s11 + $0x3d0] sm:$0xff] }
  0x2e   : > { %275 = vst [vmem:[%s1878_s12 + $0x140] sm:$0xff] %v274_v40  ;;  %277 = vst [vmem:[%s1878_s12 + $0x148] sm:$0xff] %v276_v41  ;;  %v280_v43 = vld [vmem:[%s1873_s11 + $0x3d8] sm:$0xff]  ;;  %v282_v44 = vld [vmem:[%s1873_s11 + $0x420] sm:$0xff] }
  0x2f   : > { %279 = vst [vmem:[%s1878_s12 + $0x150] sm:$0xff] %v278_v42  ;;  %281 = vst [vmem:[%s1878_s12 + $0x158] sm:$0xff] %v280_v43  ;;  %v284_v45 = vld [vmem:[%s1873_s11 + $0x428] sm:$0xff]  ;;  %v286_v46 = vld [vmem:[%s1873_s11 + $0x430] sm:$0xff] }
  0x30   : > { %283 = vst [vmem:[%s1878_s12 + $0x160] sm:$0xff] %v282_v44  ;;  %v288_v47 = vld [vmem:[%s1873_s11 + $0x438] sm:$0xff]  ;;  %285 = vst [vmem:[%s1878_s12 + $0x168] sm:$0xff] %v284_v45  ;;  %v290_v48 = vld [vmem:[%s1873_s11 + $0x480] sm:$0xff] }
  0x31   : > { %287 = vst [vmem:[%s1878_s12 + $0x170] sm:$0xff] %v286_v46  ;;  %289 = vst [vmem:[%s1878_s12 + $0x178] sm:$0xff] %v288_v47  ;;  %v292_v49 = vld [vmem:[%s1873_s11 + $0x488] sm:$0xff]  ;;  %v294_v50 = vld [vmem:[%s1873_s11 + $0x490] sm:$0xff] }
  0x32   : > { %291 = vst [vmem:[%s1878_s12 + $0x180] sm:$0xff] %v290_v48  ;;  %293 = vst [vmem:[%s1878_s12 + $0x188] sm:$0xff] %v292_v49  ;;  %v296_v51 = vld [vmem:[%s1873_s11 + $0x498] sm:$0xff]  ;;  %v298_v52 = vld [vmem:[%s1873_s11 + $0x4e0] sm:$0xff] }
  0x33   : > { %295 = vst [vmem:[%s1878_s12 + $0x190] sm:$0xff] %v294_v50  ;;  %v300_v53 = vld [vmem:[%s1873_s11 + $0x4e8] sm:$0xff]  ;;  %297 = vst [vmem:[%s1878_s12 + $0x198] sm:$0xff] %v296_v51  ;;  %v302_v54 = vld [vmem:[%s1873_s11 + $0x4f0] sm:$0xff] }
  0x34   : > { %299 = vst [vmem:[%s1878_s12 + $0x1a0] sm:$0xff] %v298_v52  ;;  %301 = vst [vmem:[%s1878_s12 + $0x1a8] sm:$0xff] %v300_v53  ;;  %v304_v55 = vld [vmem:[%s1873_s11 + $0x4f8] sm:$0xff]  ;;  %v306_v56 = vld [vmem:[%s1873_s11 + $0x540] sm:$0xff] }
  0x35   : > { %303 = vst [vmem:[%s1878_s12 + $0x1b0] sm:$0xff] %v302_v54  ;;  %305 = vst [vmem:[%s1878_s12 + $0x1b8] sm:$0xff] %v304_v55  ;;  %v308_v57 = vld [vmem:[%s1873_s11 + $0x548] sm:$0xff]  ;;  %v310_v58 = vld [vmem:[%s1873_s11 + $0x550] sm:$0xff] }
  0x36   : > { %307 = vst [vmem:[%s1878_s12 + $0x1c0] sm:$0xff] %v306_v56  ;;  %v312_v59 = vld [vmem:[%s1873_s11 + $0x558] sm:$0xff]  ;;  %309 = vst [vmem:[%s1878_s12 + $0x1c8] sm:$0xff] %v308_v57  ;;  %v314_v60 = vld [vmem:[%s1873_s11 + $0x5a0] sm:$0xff] }
  0x37   : > { %311 = vst [vmem:[%s1878_s12 + $0x1d0] sm:$0xff] %v310_v58  ;;  %313 = vst [vmem:[%s1878_s12 + $0x1d8] sm:$0xff] %v312_v59  ;;  %v316_v61 = vld [vmem:[%s1873_s11 + $0x5a8] sm:$0xff]  ;;  %v318_v62 = vld [vmem:[%s1873_s11 + $0x5b0] sm:$0xff] }
  0x38   : > { %315 = vst [vmem:[%s1878_s12 + $0x1e0] sm:$0xff] %v314_v60  ;;  %317 = vst [vmem:[%s1878_s12 + $0x1e8] sm:$0xff] %v316_v61  ;;  %v320_v63 = vld [vmem:[%s1873_s11 + $0x5b8] sm:$0xff]  ;;  %v322_v0 = vld [vmem:[%s1873_s11 + $0x600] sm:$0xff] }
  0x39   : > { %319 = vst [vmem:[%s1878_s12 + $0x1f0] sm:$0xff] %v318_v62  ;;  %v324_v1 = vld [vmem:[%s1873_s11 + $0x608] sm:$0xff]  ;;  %321 = vst [vmem:[%s1878_s12 + $0x1f8] sm:$0xff] %v320_v63  ;;  %v326_v2 = vld [vmem:[%s1873_s11 + $0x610] sm:$0xff] }
  0x3a   : > { %323 = vst [vmem:[%s1878_s12 + $0x200] sm:$0xff] %v322_v0  ;;  %325 = vst [vmem:[%s1878_s12 + $0x208] sm:$0xff] %v324_v1  ;;  %v328_v3 = vld [vmem:[%s1873_s11 + $0x618] sm:$0xff]  ;;  %v330_v4 = vld [vmem:[%s1873_s11 + $0x660] sm:$0xff] }
  0x3b   : > { %327 = vst [vmem:[%s1878_s12 + $0x210] sm:$0xff] %v326_v2  ;;  %329 = vst [vmem:[%s1878_s12 + $0x218] sm:$0xff] %v328_v3  ;;  %v332_v5 = vld [vmem:[%s1873_s11 + $0x668] sm:$0xff]  ;;  %v334_v6 = vld [vmem:[%s1873_s11 + $0x670] sm:$0xff] }
  0x3c   : > { %331 = vst [vmem:[%s1878_s12 + $0x220] sm:$0xff] %v330_v4  ;;  %v336_v7 = vld [vmem:[%s1873_s11 + $0x678] sm:$0xff]  ;;  %333 = vst [vmem:[%s1878_s12 + $0x228] sm:$0xff] %v332_v5  ;;  %v338_v8 = vld [vmem:[%s1873_s11 + $0x6c0] sm:$0xff] }
  0x3d   : > { %335 = vst [vmem:[%s1878_s12 + $0x230] sm:$0xff] %v334_v6  ;;  %337 = vst [vmem:[%s1878_s12 + $0x238] sm:$0xff] %v336_v7  ;;  %v340_v9 = vld [vmem:[%s1873_s11 + $0x6c8] sm:$0xff]  ;;  %v342_v10 = vld [vmem:[%s1873_s11 + $0x6d0] sm:$0xff] }
  0x3e   : > { %339 = vst [vmem:[%s1878_s12 + $0x240] sm:$0xff] %v338_v8  ;;  %341 = vst [vmem:[%s1878_s12 + $0x248] sm:$0xff] %v340_v9  ;;  %v344_v11 = vld [vmem:[%s1873_s11 + $0x6d8] sm:$0xff]  ;;  %v346_v12 = vld [vmem:[%s1873_s11 + $0x720] sm:$0xff] }
  0x3f   : > { %343 = vst [vmem:[%s1878_s12 + $0x250] sm:$0xff] %v342_v10  ;;  %v348_v13 = vld [vmem:[%s1873_s11 + $0x728] sm:$0xff]  ;;  %345 = vst [vmem:[%s1878_s12 + $0x258] sm:$0xff] %v344_v11  ;;  %v350_v14 = vld [vmem:[%s1873_s11 + $0x730] sm:$0xff] }
  0x40   : > { %347 = vst [vmem:[%s1878_s12 + $0x260] sm:$0xff] %v346_v12  ;;  %349 = vst [vmem:[%s1878_s12 + $0x268] sm:$0xff] %v348_v13  ;;  %v352_v15 = vld [vmem:[%s1873_s11 + $0x738] sm:$0xff] }
  0x41   : > { %351 = vst [vmem:[%s1878_s12 + $0x270] sm:$0xff] %v350_v14  ;;  %353 = vst [vmem:[%s1878_s12 + $0x278] sm:$0xff] %v352_v15 }
  0x42 PF: > { %p1490_p7 = scmp.ge.s32.totalorder %s1785_s21, 1  ;;  %p368_p8 = scmp.lt.s32.totalorder %s1785_s21, 7 }
  0x44   : > { %p369_p9 = pnand %p1490_p7, %p368_p8 }
  0x45   : > { %s375_s13 = sand.u32 (!%p369_p9), 1, %s1761_s15   ;;  %s1491_s14 = sshll.u32 (!%p369_p9), %s1769_s17, 6 }
  0x46   : > { %372 = sbr.rel (%p369_p9) target bundleno = 484 (0x1e4), region = 55  ;;  %p410_p10 = scmp.lt.s32.totalorder (!%p369_p9), %s1491_s14, 191 }
  0x47   : > { %s1672_s24 = smul.u32 (!%p369_p9), 640, %s375_s13  ;;  %p1496_p12 = scmp.ne.s32.totalorder (!%p369_p9), %s1769_s17, 0 }
  0x48   : > { %s416_s25 = smul.u32 (!%p369_p9), 20, %s1773_s18 }
  0x49   : > { %s2052_s15 = scalar_lea.vmem (!%p369_p9), [#allocation3], %s1672_s24 }
  0x4a   : > { %p417_p11 = scmp.lt.s32.totalorder (!%p369_p9), %s416_s25, 39 }
  0x4d   : > { %s2437_s14 = smov (!%p410_p10, %s1491_s14), 191  ;;  %s2439_s25 = smov (!%p417_p11, %s416_s25), 39 }
  0x4e   : > { %s1500_s26 = sshll.u32 %s2437_s14, 4  ;;  %s1501_s5 = sshll.u32 %s2439_s25, 4  ;;  %v1787_v16 = vmov (!%p1496_p12), 0.0  }
  0x4f   : > { %s2045_s30 = scalar_lea.vmem %s2420_s1, %s1500_s26  ;;  %s2050_s8 = scalar_lea.vmem %s2423_s4, %s1501_s5  ;;  %427 = vst [vmem:[#allocation2] sm:$0xff] (!%p1496_p12), %v1787_v16  ;;  %428 = vst [vmem:[#allocation2 + $0x8] sm:$0xff] (!%p1496_p12), %v1787_v16 }
  0x50   : > { %426 = sbr.rel (%p1496_p12) target bundleno = 99 (0x63), region = 63  ;;  %429 = vst [vmem:[#allocation2 + $0x10] sm:$0xff] (!%p1496_p12), %v1787_v16  ;;  %430 = vst [vmem:[#allocation2 + $0x18] sm:$0xff] (!%p1496_p12), %v1787_v16 }
  0x51   : > { %431 = vst [vmem:[#allocation2 + $0x20] sm:$0xff] (!%p1496_p12), %v1787_v16  ;;  %432 = vst [vmem:[#allocation2 + $0x28] sm:$0xff] (!%p1496_p12), %v1787_v16 }
  0x52   : > { %433 = vst [vmem:[#allocation2 + $0x30] sm:$0xff] (!%p1496_p12), %v1787_v16  ;;  %434 = vst [vmem:[#allocation2 + $0x38] sm:$0xff] (!%p1496_p12), %v1787_v16 }
  0x53   : > { %435 = vst [vmem:[#allocation2 + $0x40] sm:$0xff] (!%p1496_p12), %v1787_v16  ;;  %436 = vst [vmem:[#allocation2 + $0x48] sm:$0xff] (!%p1496_p12), %v1787_v16 }
  0x54   : > { %437 = vst [vmem:[#allocation2 + $0x50] sm:$0xff] (!%p1496_p12), %v1787_v16  ;;  %438 = vst [vmem:[#allocation2 + $0x58] sm:$0xff] (!%p1496_p12), %v1787_v16 }
  0x55   : > { %439 = vst [vmem:[#allocation2 + $0x60] sm:$0xff] (!%p1496_p12), %v1787_v16  ;;  %440 = vst [vmem:[#allocation2 + $0x68] sm:$0xff] (!%p1496_p12), %v1787_v16 }
  0x56   : > { %441 = vst [vmem:[#allocation2 + $0x70] sm:$0xff] (!%p1496_p12), %v1787_v16  ;;  %442 = vst [vmem:[#allocation2 + $0x78] sm:$0xff] (!%p1496_p12), %v1787_v16 }
  0x57   : > { %443 = vst [vmem:[#allocation2 + $0x80] sm:$0xff] %v1787_v16  ;;  %444 = vst [vmem:[#allocation2 + $0x88] sm:$0xff] %v1787_v16 }
  0x58   : > { %445 = vst [vmem:[#allocation2 + $0x90] sm:$0xff] %v1787_v16  ;;  %446 = vst [vmem:[#allocation2 + $0x98] sm:$0xff] %v1787_v16 }
  0x59   : > { %447 = vst [vmem:[#allocation2 + $0xa0] sm:$0xff] %v1787_v16  ;;  %448 = vst [vmem:[#allocation2 + $0xa8] sm:$0xff] %v1787_v16 }
  0x5a   : > { %449 = vst [vmem:[#allocation2 + $0xb0] sm:$0xff] %v1787_v16  ;;  %450 = vst [vmem:[#allocation2 + $0xb8] sm:$0xff] %v1787_v16 }
  0x5b   : > { %451 = vst [vmem:[#allocation2 + $0xc0] sm:$0xff] %v1787_v16  ;;  %452 = vst [vmem:[#allocation2 + $0xc8] sm:$0xff] %v1787_v16 }
  0x5c   : > { %453 = vst [vmem:[#allocation2 + $0xd0] sm:$0xff] %v1787_v16  ;;  %454 = vst [vmem:[#allocation2 + $0xd8] sm:$0xff] %v1787_v16 }
  0x5d   : > { %455 = vst [vmem:[#allocation2 + $0xe0] sm:$0xff] %v1787_v16  ;;  %456 = vst [vmem:[#allocation2 + $0xe8] sm:$0xff] %v1787_v16 }
  0x5e   : > { %457 = vst [vmem:[#allocation2 + $0xf0] sm:$0xff] %v1787_v16  ;;  %458 = vst [vmem:[#allocation2 + $0xf8] sm:$0xff] %v1787_v16 }
  0x5f   : > { %459 = vst [vmem:[#allocation2 + $0x100] sm:$0xff] %v1787_v16  ;;  %460 = vst [vmem:[#allocation2 + $0x108] sm:$0xff] %v1787_v16 }
  0x60   : > { %461 = vst [vmem:[#allocation2 + $0x110] sm:$0xff] %v1787_v16  ;;  %462 = vst [vmem:[#allocation2 + $0x118] sm:$0xff] %v1787_v16 }
  0x61   : > { %463 = vst [vmem:[#allocation2 + $0x120] sm:$0xff] %v1787_v16  ;;  %464 = vst [vmem:[#allocation2 + $0x128] sm:$0xff] %v1787_v16 }
  0x62   : > { %465 = vst [vmem:[#allocation2 + $0x130] sm:$0xff] %v1787_v16  ;;  %466 = vst [vmem:[#allocation2 + $0x138] sm:$0xff] %v1787_v16 }
  0x63 PF: > { %v588_v17 = vld [vmem:[%s2045_s30 + $0x8] sm:$0xff]  ;;  %v590_v18 = vld [vmem:[%s2045_s30 + $0x18] sm:$0xff]  ;;  %v587_v22 = vld [vmem:[%s2045_s30] sm:$0xff]  ;;  %p1497_p13 = scmp.ne.s32.totalorder %s1769_s17, 2 }
  0x64   : > { %v652_v19 = vld [vmem:[%s2045_s30 + $0x208] sm:$0xff]  ;;  %v1502_v20 = vpack.c.bf16 %v590_v18, %v588_v17  ;;  %v654_v21 = vld [vmem:[%s2045_s30 + $0x218] sm:$0xff]  ;;  %v589_v23 = vld [vmem:[%s2045_s30 + $0x10] sm:$0xff] }
  0x65   : > { %v1566_v24 = vpack.c.bf16 %v654_v21, %v652_v19  ;;  %v1504_v25 = vpack.c.bf16 %v589_v23, %v587_v22  ;;  %v651_v26 = vld [vmem:[%s2045_s30 + $0x200] sm:$0xff]  ;;  %v653_v27 = vld [vmem:[%s2045_s30 + $0x210] sm:$0xff]  ;;  %v592_v28 = vld [vmem:[%s2045_s30 + $0x28] sm:$0xff] }
  0x66   : > { %1503 = vmatprep.subr.bf16.mxu1 %v1502_v20  ;;  %v1568_v29 = vpack.c.bf16 %v653_v27, %v651_v26  ;;  %v594_v30 = vld [vmem:[%s2045_s30 + $0x38] sm:$0xff]  ;;  %v656_v31 = vld [vmem:[%s2045_s30 + $0x228] sm:$0xff]  ;;  %v591_v35 = vld [vmem:[%s2045_s30 + $0x20] sm:$0xff] }
  0x67   : > { %v658_v32 = vld [vmem:[%s2045_s30 + $0x238] sm:$0xff]  ;;  %1567 = vmatprep.subr.bf16.mxu0 %v1566_v24  ;;  %1505 = vmatpush1.bf16.msra.mxu1 %v1504_v25  ;;  %v1506_v33 = vpack.c.bf16 %v594_v30, %v592_v28  ;;  %v593_v36 = vld [vmem:[%s2045_s30 + $0x30] sm:$0xff]  ;;  %v655_v37 = vld [vmem:[%s2045_s30 + $0x220] sm:$0xff] }
  0x68   : > { %v1570_v34 = vpack.c.bf16 %v658_v32, %v656_v31  ;;  %1569 = vmatpush1.bf16.msra.mxu0 %v1568_v29  ;;  %v1508_v38 = vpack.c.bf16 %v593_v36, %v591_v35  ;;  %v657_v39 = vld [vmem:[%s2045_s30 + $0x230] sm:$0xff]  ;;  %v596_v40 = vld [vmem:[%s2045_s30 + $0x48] sm:$0xff]  ;;  %v598_v41 = vld [vmem:[%s2045_s30 + $0x58] sm:$0xff] }
  0x69   : > { %1507 = vmatprep.subr.bf16.mxu1 %v1506_v33  ;;  %v1572_v42 = vpack.c.bf16 %v657_v39, %v655_v37  ;;  %v1510_v43 = vpack.c.bf16 %v598_v41, %v596_v40  ;;  %v660_v44 = vld [vmem:[%s2045_s30 + $0x248] sm:$0xff]  ;;  %v662_v45 = vld [vmem:[%s2045_s30 + $0x258] sm:$0xff]  ;;  %v595_v46 = vld [vmem:[%s2045_s30 + $0x40] sm:$0xff] }
  0x6a   : > { %1571 = vmatprep.subr.bf16.mxu0 %v1570_v34  ;;  %v1574_v47 = vpack.c.bf16 %v662_v45, %v660_v44  ;;  %v597_v48 = vld [vmem:[%s2045_s30 + $0x50] sm:$0xff]  ;;  %v659_v49 = vld [vmem:[%s2045_s30 + $0x240] sm:$0xff]  ;;  %v600_v52 = vld [vmem:[%s2045_s30 + $0x68] sm:$0xff] }
  0x6b   : > { %v661_v50 = vld [vmem:[%s2045_s30 + $0x250] sm:$0xff]  ;;  %1509 = vmatpush1.bf16.msra.mxu1 %v1508_v38  ;;  %v1512_v51 = vpack.c.bf16 %v597_v48, %v595_v46  ;;  %v602_v53 = vld [vmem:[%s2045_s30 + $0x78] sm:$0xff]  ;;  %v664_v54 = vld [vmem:[%s2045_s30 + $0x268] sm:$0xff] }
  0x6c   : > { %1573 = vmatpush1.bf16.msra.mxu0 %v1572_v42  ;;  %1511 = vmatprep.subr.bf16.mxu1 %v1510_v43  ;;  %v1576_v55 = vpack.c.bf16 %v661_v50, %v659_v49  ;;  %v1514_v56 = vpack.c.bf16 %v602_v53, %v600_v52  ;;  %v666_v57 = vld [vmem:[%s2045_s30 + $0x278] sm:$0xff]  ;;  %v599_v58 = vld [vmem:[%s2045_s30 + $0x60] sm:$0xff]  ;;  %v601_v59 = vld [vmem:[%s2045_s30 + $0x70] sm:$0xff] }
  0x6d   : > { %1575 = vmatprep.subr.bf16.mxu0 %v1574_v47  ;;  %v1578_v60 = vpack.c.bf16 %v666_v57, %v664_v54  ;;  %v663_v61 = vld [vmem:[%s2045_s30 + $0x260] sm:$0xff]  ;;  %v665_v62 = vld [vmem:[%s2045_s30 + $0x270] sm:$0xff]  ;;  %v604_v63 = vld [vmem:[%s2045_s30 + $0x88] sm:$0xff]  ;;  %v1516_v3 = vpack.c.bf16 %v601_v59, %v599_v58 }
  0x6e   : > { %v606_v0 = vld [vmem:[%s2045_s30 + $0x98] sm:$0xff]  ;;  %v668_v1 = vld [vmem:[%s2045_s30 + $0x288] sm:$0xff]  ;;  %v1580_v4 = vpack.c.bf16 %v665_v62, %v663_v61  ;;  %v603_v6 = vld [vmem:[%s2045_s30 + $0x80] sm:$0xff] }
  0x6f   : > { %v670_v2 = vld [vmem:[%s2045_s30 + $0x298] sm:$0xff]  ;;  %1513 = vmatpush1.bf16.msra.mxu1 %v1512_v51  ;;  %v1518_v5 = vpack.c.bf16 %v606_v0, %v604_v63  ;;  %v605_v7 = vld [vmem:[%s2045_s30 + $0x90] sm:$0xff]  ;;  %v667_v8 = vld [vmem:[%s2045_s30 + $0x280] sm:$0xff] }
  0x70   : > { %1577 = vmatpush1.bf16.msra.mxu0 %v1576_v55  ;;  %1515 = vmatprep.subr.bf16.mxu1 %v1514_v56  ;;  %v1582_v9 = vpack.c.bf16 %v670_v2, %v668_v1  ;;  %v669_v10 = vld [vmem:[%s2045_s30 + $0x290] sm:$0xff]  ;;  %v608_v11 = vld [vmem:[%s2045_s30 + $0xa8] sm:$0xff]  ;;  %v610_v12 = vld [vmem:[%s2045_s30 + $0xb8] sm:$0xff]  ;;  %v1520_v15 = vpack.c.bf16 %v605_v7, %v603_v6 }
  0x71   : > { %1579 = vmatprep.subr.bf16.mxu0 %v1578_v60  ;;  %v672_v13 = vld [vmem:[%s2045_s30 + $0x2a8] sm:$0xff]  ;;  %v674_v14 = vld [vmem:[%s2045_s30 + $0x2b8] sm:$0xff]  ;;  %v1584_v16 = vpack.c.bf16 %v669_v10, %v667_v8  ;;  %v1522_v17 = vpack.c.bf16 %v610_v12, %v608_v11  ;;  %v607_v18 = vld [vmem:[%s2045_s30 + $0xa0] sm:$0xff] }
  0x72   : > { %v609_v19 = vld [vmem:[%s2045_s30 + $0xb0] sm:$0xff]  ;;  %v671_v20 = vld [vmem:[%s2045_s30 + $0x2a0] sm:$0xff]  ;;  %v1586_v21 = vpack.c.bf16 %v674_v14, %v672_v13  ;;  %v612_v23 = vld [vmem:[%s2045_s30 + $0xc8] sm:$0xff] }
  0x73   : > { %1517 = vmatpush1.bf16.msra.mxu1 %v1516_v3  ;;  %v673_v22 = vld [vmem:[%s2045_s30 + $0x2b0] sm:$0xff]  ;;  %v614_v24 = vld [vmem:[%s2045_s30 + $0xd8] sm:$0xff]  ;;  %v676_v25 = vld [vmem:[%s2045_s30 + $0x2c8] sm:$0xff]  ;;  %v1524_v27 = vpack.c.bf16 %v609_v19, %v607_v18 }
  0x74   : > { %1581 = vmatpush1.bf16.msra.mxu0 %v1580_v4  ;;  %1519 = vmatprep.subr.bf16.mxu1 %v1518_v5  ;;  %v678_v26 = vld [vmem:[%s2045_s30 + $0x2d8] sm:$0xff]  ;;  %v1588_v28 = vpack.c.bf16 %v673_v22, %v671_v20  ;;  %v1526_v29 = vpack.c.bf16 %v614_v24, %v612_v23  ;;  %v611_v30 = vld [vmem:[%s2045_s30 + $0xc0] sm:$0xff]  ;;  %v613_v31 = vld [vmem:[%s2045_s30 + $0xd0] sm:$0xff] }
  0x75   : > { %1583 = vmatprep.subr.bf16.mxu0 %v1582_v9  ;;  %v675_v32 = vld [vmem:[%s2045_s30 + $0x2c0] sm:$0xff]  ;;  %v1590_v33 = vpack.c.bf16 %v678_v26, %v676_v25  ;;  %v677_v34 = vld [vmem:[%s2045_s30 + $0x2d0] sm:$0xff]  ;;  %v616_v35 = vld [vmem:[%s2045_s30 + $0xe8] sm:$0xff]  ;;  %v1528_v39 = vpack.c.bf16 %v613_v31, %v611_v30 }
  0x76   : > { %v618_v36 = vld [vmem:[%s2045_s30 + $0xf8] sm:$0xff]  ;;  %v680_v37 = vld [vmem:[%s2045_s30 + $0x2e8] sm:$0xff]  ;;  %v1592_v40 = vpack.c.bf16 %v677_v34, %v675_v32  ;;  %v615_v42 = vld [vmem:[%s2045_s30 + $0xe0] sm:$0xff] }
  0x77   : > { %1521 = vmatpush1.bf16.msra.mxu1 %v1520_v15  ;;  %v682_v38 = vld [vmem:[%s2045_s30 + $0x2f8] sm:$0xff]  ;;  %v1530_v41 = vpack.c.bf16 %v618_v36, %v616_v35  ;;  %v617_v43 = vld [vmem:[%s2045_s30 + $0xf0] sm:$0xff]  ;;  %v679_v44 = vld [vmem:[%s2045_s30 + $0x2e0] sm:$0xff] }
  0x78   : > { %1585 = vmatpush1.bf16.msra.mxu0 %v1584_v16  ;;  %1523 = vmatprep.subr.bf16.mxu1 %v1522_v17  ;;  %v1594_v45 = vpack.c.bf16 %v682_v38, %v680_v37  ;;  %v681_v46 = vld [vmem:[%s2045_s30 + $0x2f0] sm:$0xff]  ;;  %v620_v47 = vld [vmem:[%s2045_s30 + $0x108] sm:$0xff]  ;;  %v622_v48 = vld [vmem:[%s2045_s30 + $0x118] sm:$0xff]  ;;  %v1532_v51 = vpack.c.bf16 %v617_v43, %v615_v42 }
  0x79   : > { %1587 = vmatprep.subr.bf16.mxu0 %v1586_v21  ;;  %v684_v49 = vld [vmem:[%s2045_s30 + $0x308] sm:$0xff]  ;;  %v686_v50 = vld [vmem:[%s2045_s30 + $0x318] sm:$0xff]  ;;  %v1596_v52 = vpack.c.bf16 %v681_v46, %v679_v44  ;;  %v1534_v53 = vpack.c.bf16 %v622_v48, %v620_v47  ;;  %v619_v54 = vld [vmem:[%s2045_s30 + $0x100] sm:$0xff] }
  0x7a   : > { %v621_v55 = vld [vmem:[%s2045_s30 + $0x110] sm:$0xff]  ;;  %v683_v56 = vld [vmem:[%s2045_s30 + $0x300] sm:$0xff]  ;;  %v1598_v57 = vpack.c.bf16 %v686_v50, %v684_v49  ;;  %v624_v59 = vld [vmem:[%s2045_s30 + $0x128] sm:$0xff] }
  0x7b   : > { %1525 = vmatpush1.bf16.msra.mxu1 %v1524_v27  ;;  %v685_v58 = vld [vmem:[%s2045_s30 + $0x310] sm:$0xff]  ;;  %v626_v60 = vld [vmem:[%s2045_s30 + $0x138] sm:$0xff]  ;;  %v688_v61 = vld [vmem:[%s2045_s30 + $0x328] sm:$0xff]  ;;  %v1536_v63 = vpack.c.bf16 %v621_v55, %v619_v54 }
  0x7c   : > { %1589 = vmatpush1.bf16.msra.mxu0 %v1588_v28  ;;  %1527 = vmatprep.subr.bf16.mxu1 %v1526_v29  ;;  %v690_v62 = vld [vmem:[%s2045_s30 + $0x338] sm:$0xff]  ;;  %v1600_v0 = vpack.c.bf16 %v685_v58, %v683_v56  ;;  %v1538_v1 = vpack.c.bf16 %v626_v60, %v624_v59  ;;  %v623_v2 = vld [vmem:[%s2045_s30 + $0x120] sm:$0xff]  ;;  %v625_v3 = vld [vmem:[%s2045_s30 + $0x130] sm:$0xff] }
  0x7d   : > { %1591 = vmatprep.subr.bf16.mxu0 %v1590_v33  ;;  %v687_v4 = vld [vmem:[%s2045_s30 + $0x320] sm:$0xff]  ;;  %v1602_v5 = vpack.c.bf16 %v690_v62, %v688_v61  ;;  %v689_v6 = vld [vmem:[%s2045_s30 + $0x330] sm:$0xff]  ;;  %v628_v7 = vld [vmem:[%s2045_s30 + $0x148] sm:$0xff]  ;;  %v1540_v11 = vpack.c.bf16 %v625_v3, %v623_v2 }
  0x7e   : > { %v630_v8 = vld [vmem:[%s2045_s30 + $0x158] sm:$0xff]  ;;  %v692_v9 = vld [vmem:[%s2045_s30 + $0x348] sm:$0xff]  ;;  %v1604_v12 = vpack.c.bf16 %v689_v6, %v687_v4  ;;  %v627_v14 = vld [vmem:[%s2045_s30 + $0x140] sm:$0xff] }
  0x7f   : > { %1529 = vmatpush1.bf16.msra.mxu1 %v1528_v39  ;;  %v694_v10 = vld [vmem:[%s2045_s30 + $0x358] sm:$0xff]  ;;  %v1542_v13 = vpack.c.bf16 %v630_v8, %v628_v7  ;;  %v629_v15 = vld [vmem:[%s2045_s30 + $0x150] sm:$0xff]  ;;  %v691_v16 = vld [vmem:[%s2045_s30 + $0x340] sm:$0xff] }
  0x80   : > { %1593 = vmatpush1.bf16.msra.mxu0 %v1592_v40  ;;  %1531 = vmatprep.subr.bf16.mxu1 %v1530_v41  ;;  %v1606_v17 = vpack.c.bf16 %v694_v10, %v692_v9  ;;  %v693_v18 = vld [vmem:[%s2045_s30 + $0x350] sm:$0xff]  ;;  %v632_v19 = vld [vmem:[%s2045_s30 + $0x168] sm:$0xff]  ;;  %v634_v20 = vld [vmem:[%s2045_s30 + $0x178] sm:$0xff]  ;;  %v1544_v23 = vpack.c.bf16 %v629_v15, %v627_v14 }
  0x81   : > { %1595 = vmatprep.subr.bf16.mxu0 %v1594_v45  ;;  %v696_v21 = vld [vmem:[%s2045_s30 + $0x368] sm:$0xff]  ;;  %v698_v22 = vld [vmem:[%s2045_s30 + $0x378] sm:$0xff]  ;;  %v631_v24 = vld [vmem:[%s2045_s30 + $0x160] sm:$0xff]  ;;  %v1608_v25 = vpack.c.bf16 %v693_v18, %v691_v16  ;;  %v1546_v26 = vpack.c.bf16 %v634_v20, %v632_v19 }
  0x82   : > { %v633_v27 = vld [vmem:[%s2045_s30 + $0x170] sm:$0xff]  ;;  %v695_v28 = vld [vmem:[%s2045_s30 + $0x360] sm:$0xff]  ;;  %v1610_v30 = vpack.c.bf16 %v698_v22, %v696_v21  ;;  %v636_v31 = vld [vmem:[%s2045_s30 + $0x188] sm:$0xff] }
  0x83   : > { %1533 = vmatpush1.bf16.msra.mxu1 %v1532_v51  ;;  %v697_v29 = vld [vmem:[%s2045_s30 + $0x370] sm:$0xff]  ;;  %v638_v32 = vld [vmem:[%s2045_s30 + $0x198] sm:$0xff]  ;;  %v508_v33 = vld [vmem:[%s2052_s15 + $0x8] sm:$0xff]  ;;  %v1548_v37 = vpack.c.bf16 %v633_v27, %v631_v24 }
  0x84   : > { %1597 = vmatpush1.bf16.msra.mxu0 %v1596_v52  ;;  %1535 = vmatprep.subr.bf16.mxu1 %v1534_v53  ;;  %v700_v34 = vld [vmem:[%s2045_s30 + $0x388] sm:$0xff]  ;;  %v702_v35 = vld [vmem:[%s2045_s30 + $0x398] sm:$0xff]  ;;  %v1612_v38 = vpack.c.bf16 %v697_v29, %v695_v28  ;;  %v1550_v39 = vpack.c.bf16 %v638_v32, %v636_v31  ;;  %v635_v40 = vld [vmem:[%s2045_s30 + $0x180] sm:$0xff] }
  0x85   : > { %1599 = vmatprep.subr.bf16.mxu0 %v1598_v57  ;;  %779 = vmatprep.mubr.f32.mxu1 %v508_v33  ;;  %v510_v36 = vld [vmem:[%s2052_s15 + $0x18] sm:$0xff]  ;;  %v637_v41 = vld [vmem:[%s2045_s30 + $0x190] sm:$0xff]  ;;  %v699_v42 = vld [vmem:[%s2045_s30 + $0x380] sm:$0xff]  ;;  %v1614_v43 = vpack.c.bf16 %v702_v35, %v700_v34 }
  0x86   : > { %964 = vmatprep.mubr.f32.mxu0 %v510_v36  ;;  %v701_v44 = vld [vmem:[%s2045_s30 + $0x390] sm:$0xff]  ;;  %v640_v45 = vld [vmem:[%s2045_s30 + $0x1a8] sm:$0xff]  ;;  %v642_v46 = vld [vmem:[%s2045_s30 + $0x1b8] sm:$0xff]  ;;  %v1552_v49 = vpack.c.bf16 %v637_v41, %v635_v40 }
  0x87   : > { %1537 = vmatpush1.bf16.msra.mxu1 %v1536_v63  ;;  %v704_v47 = vld [vmem:[%s2045_s30 + $0x3a8] sm:$0xff]  ;;  %v706_v48 = vld [vmem:[%s2045_s30 + $0x3b8] sm:$0xff]  ;;  %v1616_v50 = vpack.c.bf16 %v701_v44, %v699_v42  ;;  %v1554_v51 = vpack.c.bf16 %v642_v46, %v640_v45  ;;  %v639_v52 = vld [vmem:[%s2045_s30 + $0x1a0] sm:$0xff] }
  0x88   : > { %1601 = vmatpush1.bf16.msra.mxu0 %v1600_v0  ;;  %1539 = vmatprep.subr.bf16.mxu1 %v1538_v1  ;;  %v641_v53 = vld [vmem:[%s2045_s30 + $0x1b0] sm:$0xff]  ;;  %v703_v54 = vld [vmem:[%s2045_s30 + $0x3a0] sm:$0xff]  ;;  %v1618_v55 = vpack.c.bf16 %v706_v48, %v704_v47  ;;  %v644_v57 = vld [vmem:[%s2045_s30 + $0x1c8] sm:$0xff] }
  0x89   : > { %1603 = vmatprep.subr.bf16.mxu0 %v1602_v5  ;;  %v705_v56 = vld [vmem:[%s2045_s30 + $0x3b0] sm:$0xff]  ;;  %v646_v58 = vld [vmem:[%s2045_s30 + $0x1d8] sm:$0xff]  ;;  %v708_v59 = vld [vmem:[%s2045_s30 + $0x3c8] sm:$0xff]  ;;  %v1556_v61 = vpack.c.bf16 %v641_v53, %v639_v52 }
  0x8a   : > { %v710_v60 = vld [vmem:[%s2045_s30 + $0x3d8] sm:$0xff]  ;;  %v1620_v62 = vpack.c.bf16 %v705_v56, %v703_v54  ;;  %v1558_v63 = vpack.c.bf16 %v646_v58, %v644_v57  ;;  %v643_v0 = vld [vmem:[%s2045_s30 + $0x1c0] sm:$0xff]  ;;  %v645_v1 = vld [vmem:[%s2045_s30 + $0x1d0] sm:$0xff] }
  0x8b   : > { %1541 = vmatpush1.bf16.msra.mxu1 %v1540_v11  ;;  %v707_v2 = vld [vmem:[%s2045_s30 + $0x3c0] sm:$0xff]  ;;  %v1622_v3 = vpack.c.bf16 %v710_v60, %v708_v59  ;;  %v709_v4 = vld [vmem:[%s2045_s30 + $0x3d0] sm:$0xff]  ;;  %v648_v5 = vld [vmem:[%s2045_s30 + $0x1e8] sm:$0xff]  ;;  %v1560_v9 = vpack.c.bf16 %v645_v1, %v643_v0 }
  0x8c   : > { %1605 = vmatpush1.bf16.msra.mxu0 %v1604_v12  ;;  %1543 = vmatprep.subr.bf16.mxu1 %v1542_v13  ;;  %v650_v6 = vld [vmem:[%s2045_s30 + $0x1f8] sm:$0xff]  ;;  %v712_v7 = vld [vmem:[%s2045_s30 + $0x3e8] sm:$0xff]  ;;  %v1624_v10 = vpack.c.bf16 %v709_v4, %v707_v2  ;;  %v647_v12 = vld [vmem:[%s2045_s30 + $0x1e0] sm:$0xff] }
  0x8d   : > { %1607 = vmatprep.subr.bf16.mxu0 %v1606_v17  ;;  %v714_v8 = vld [vmem:[%s2045_s30 + $0x3f8] sm:$0xff]  ;;  %v1562_v11 = vpack.c.bf16 %v650_v6, %v648_v5  ;;  %v649_v13 = vld [vmem:[%s2045_s30 + $0x1f0] sm:$0xff]  ;;  %v711_v15 = vld [vmem:[%s2045_s30 + $0x3e0] sm:$0xff] }
  0x8e   : > { %v1626_v14 = vpack.c.bf16 %v714_v8, %v712_v7  ;;  %v713_v16 = vld [vmem:[%s2045_s30 + $0x3f0] sm:$0xff]  ;;  %v1564_v17 = vpack.c.bf16 %v649_v13, %v647_v12  ;;  %v507_v19 = vld [vmem:[%s2052_s15] sm:$0xff]  ;;  %v512_v21 = vld [vmem:[%s2052_s15 + $0x28] sm:$0xff] }
  0x8f   : > { %1545 = vmatpush1.bf16.msra.mxu1 %v1544_v23  ;;  %v1628_v18 = vpack.c.bf16 %v713_v16, %v711_v15  ;;  %v509_v20 = vld [vmem:[%s2052_s15 + $0x10] sm:$0xff]  ;;  %v514_v22 = vld [vmem:[%s2052_s15 + $0x38] sm:$0xff]  ;;  %v511_v23 = vld [vmem:[%s2052_s15 + $0x20] sm:$0xff] }
  0x90   : > { %1609 = vmatpush1.bf16.msra.mxu0 %v1608_v25  ;;  %1547 = vmatprep.subr.bf16.mxu1 %v1546_v26  ;;  %v513_v24 = vld [vmem:[%s2052_s15 + $0x30] sm:$0xff]  ;;  %v516_v25 = vld [vmem:[%s2052_s15 + $0x48] sm:$0xff]  ;;  %v518_v26 = vld [vmem:[%s2052_s15 + $0x58] sm:$0xff] }
  0x91   : > { %1611 = vmatprep.subr.bf16.mxu0 %v1610_v30  ;;  %v515_v27 = vld [vmem:[%s2052_s15 + $0x40] sm:$0xff]  ;;  %v517_v28 = vld [vmem:[%s2052_s15 + $0x50] sm:$0xff]  ;;  %v520_v29 = vld [vmem:[%s2052_s15 + $0x68] sm:$0xff] }
  0x92   : > { %v522_v30 = vld [vmem:[%s2052_s15 + $0x78] sm:$0xff]  ;;  %v519_v31 = vld [vmem:[%s2052_s15 + $0x60] sm:$0xff]  ;;  %v521_v32 = vld [vmem:[%s2052_s15 + $0x70] sm:$0xff] }
  0x93   : > { %1549 = vmatpush1.bf16.msra.mxu1 %v1548_v37  ;;  %v524_v33 = vld [vmem:[%s2052_s15 + $0x88] sm:$0xff]  ;;  %v526_v34 = vld [vmem:[%s2052_s15 + $0x98] sm:$0xff]  ;;  %v523_v35 = vld [vmem:[%s2052_s15 + $0x80] sm:$0xff] }
  0x94   : > { %1613 = vmatpush1.bf16.msra.mxu0 %v1612_v38  ;;  %1551 = vmatprep.subr.bf16.mxu1 %v1550_v39  ;;  %v525_v36 = vld [vmem:[%s2052_s15 + $0x90] sm:$0xff]  ;;  %v528_v37 = vld [vmem:[%s2052_s15 + $0xa8] sm:$0xff]  ;;  %v530_v38 = vld [vmem:[%s2052_s15 + $0xb8] sm:$0xff] }
  0x95   : > { %1615 = vmatprep.subr.bf16.mxu0 %v1614_v43  ;;  %v527_v39 = vld [vmem:[%s2052_s15 + $0xa0] sm:$0xff]  ;;  %v529_v40 = vld [vmem:[%s2052_s15 + $0xb0] sm:$0xff]  ;;  %v532_v41 = vld [vmem:[%s2052_s15 + $0xc8] sm:$0xff] }
  0x96   : > { %v534_v42 = vld [vmem:[%s2052_s15 + $0xd8] sm:$0xff]  ;;  %v531_v43 = vld [vmem:[%s2052_s15 + $0xc0] sm:$0xff]  ;;  %v533_v44 = vld [vmem:[%s2052_s15 + $0xd0] sm:$0xff] }
  0x97   : > { %1553 = vmatpush1.bf16.msra.mxu1 %v1552_v49  ;;  %v536_v45 = vld [vmem:[%s2052_s15 + $0xe8] sm:$0xff]  ;;  %v538_v46 = vld [vmem:[%s2052_s15 + $0xf8] sm:$0xff]  ;;  %v535_v47 = vld [vmem:[%s2052_s15 + $0xe0] sm:$0xff] }
  0x98   : > { %1617 = vmatpush1.bf16.msra.mxu0 %v1616_v50  ;;  %1555 = vmatprep.subr.bf16.mxu1 %v1554_v51  ;;  %v537_v48 = vld [vmem:[%s2052_s15 + $0xf0] sm:$0xff]  ;;  %v540_v49 = vld [vmem:[%s2052_s15 + $0x108] sm:$0xff]  ;;  %v542_v50 = vld [vmem:[%s2052_s15 + $0x118] sm:$0xff] }
  0x99   : > { %1619 = vmatprep.subr.bf16.mxu0 %v1618_v55  ;;  %v539_v51 = vld [vmem:[%s2052_s15 + $0x100] sm:$0xff]  ;;  %v541_v52 = vld [vmem:[%s2052_s15 + $0x110] sm:$0xff]  ;;  %v544_v53 = vld [vmem:[%s2052_s15 + $0x128] sm:$0xff] }
  0x9a   : > { %v546_v54 = vld [vmem:[%s2052_s15 + $0x138] sm:$0xff]  ;;  %v543_v55 = vld [vmem:[%s2052_s15 + $0x120] sm:$0xff]  ;;  %v545_v56 = vld [vmem:[%s2052_s15 + $0x130] sm:$0xff] }
  0x9b   : > { %1557 = vmatpush1.bf16.msra.mxu1 %v1556_v61  ;;  %v548_v57 = vld [vmem:[%s2052_s15 + $0x148] sm:$0xff]  ;;  %v550_v58 = vld [vmem:[%s2052_s15 + $0x158] sm:$0xff]  ;;  %v547_v59 = vld [vmem:[%s2052_s15 + $0x140] sm:$0xff] }
  0x9c   : > { %1621 = vmatpush1.bf16.msra.mxu0 %v1620_v62  ;;  %1559 = vmatprep.subr.bf16.mxu1 %v1558_v63  ;;  %v549_v60 = vld [vmem:[%s2052_s15 + $0x150] sm:$0xff]  ;;  %v552_v61 = vld [vmem:[%s2052_s15 + $0x168] sm:$0xff]  ;;  %v554_v62 = vld [vmem:[%s2052_s15 + $0x178] sm:$0xff] }
  0x9d   : > { %1623 = vmatprep.subr.bf16.mxu0 %v1622_v3  ;;  %v551_v63 = vld [vmem:[%s2052_s15 + $0x160] sm:$0xff]  ;;  %v553_v0 = vld [vmem:[%s2052_s15 + $0x170] sm:$0xff]  ;;  %v556_v1 = vld [vmem:[%s2052_s15 + $0x188] sm:$0xff] }
  0x9e   : > { %v558_v2 = vld [vmem:[%s2052_s15 + $0x198] sm:$0xff]  ;;  %v555_v3 = vld [vmem:[%s2052_s15 + $0x180] sm:$0xff]  ;;  %v557_v4 = vld [vmem:[%s2052_s15 + $0x190] sm:$0xff] }
  0x9f   : > { %1561 = vmatpush1.bf16.msra.mxu1 %v1560_v9  ;;  %v560_v5 = vld [vmem:[%s2052_s15 + $0x1a8] sm:$0xff]  ;;  %v562_v6 = vld [vmem:[%s2052_s15 + $0x1b8] sm:$0xff]  ;;  %v559_v7 = vld [vmem:[%s2052_s15 + $0x1a0] sm:$0xff] }
  0xa0   : > { %1625 = vmatpush1.bf16.msra.mxu0 %v1624_v10  ;;  %1563 = vmatprep.subr.bf16.mxu1 %v1562_v11  ;;  %v561_v8 = vld [vmem:[%s2052_s15 + $0x1b0] sm:$0xff]  ;;  %v564_v9 = vld [vmem:[%s2052_s15 + $0x1c8] sm:$0xff]  ;;  %v566_v10 = vld [vmem:[%s2052_s15 + $0x1d8] sm:$0xff] }
  0xa1   : > { %1627 = vmatprep.subr.bf16.mxu0 %v1626_v14  ;;  %v563_v11 = vld [vmem:[%s2052_s15 + $0x1c0] sm:$0xff]  ;;  %v565_v12 = vld [vmem:[%s2052_s15 + $0x1d0] sm:$0xff]  ;;  %v568_v13 = vld [vmem:[%s2052_s15 + $0x1e8] sm:$0xff] }
  0xa2   : > { %v570_v14 = vld [vmem:[%s2052_s15 + $0x1f8] sm:$0xff]  ;;  %v567_v15 = vld [vmem:[%s2052_s15 + $0x1e0] sm:$0xff]  ;;  %v569_v16 = vld [vmem:[%s2052_s15 + $0x1f0] sm:$0xff] }
  0xa3   : > { %1565 = vmatpush1.bf16.msra.mxu1 %v1564_v17  ;;  %v572_v17 = vld [vmem:[%s2052_s15 + $0x208] sm:$0xff] }
  0xa4   : > { %1629 = vmatpush1.bf16.msra.mxu0 %v1628_v18  ;;  %v574_v18 = vld [vmem:[%s2052_s15 + $0x218] sm:$0xff] }
  0xa6   : > { %780 = vmatmul.mubr.f32.vlgmr.msra.gmra.mrb[0].mxu1 %v507_v19  ;;  %v571_v19 = vld [vmem:[%s2052_s15 + $0x200] sm:$0xff] }
  0xa7   : > { %965 = vmatmul.mubr.f32.vlgmr.msra.gmra.mrb[0].mxu0 %v509_v20  ;;  %785 = vmatprep.mubr.f32.mxu1 %v512_v21  ;;  %v573_v20 = vld [vmem:[%s2052_s15 + $0x210] sm:$0xff]  ;;  %v576_v21 = vld [vmem:[%s2052_s15 + $0x228] sm:$0xff] }
  0xa8   : > { %970 = vmatprep.mubr.f32.mxu0 %v514_v22  ;;  %v578_v22 = vld [vmem:[%s2052_s15 + $0x238] sm:$0xff] }
  0xaa   : > { %786 = vmatmul.mubr.f32.gmra.mrb[2].mxu1 %v511_v23  ;;  %v575_v23 = vld [vmem:[%s2052_s15 + $0x220] sm:$0xff] }
  0xab   : > { %971 = vmatmul.mubr.f32.gmra.mrb[2].mxu0 %v513_v24  ;;  %791 = vmatprep.mubr.f32.mxu1 %v516_v25  ;;  %v577_v24 = vld [vmem:[%s2052_s15 + $0x230] sm:$0xff]  ;;  %v580_v25 = vld [vmem:[%s2052_s15 + $0x248] sm:$0xff] }
  0xac   : > { %976 = vmatprep.mubr.f32.mxu0 %v518_v26  ;;  %v582_v26 = vld [vmem:[%s2052_s15 + $0x258] sm:$0xff] }
  0xae   : > { %792 = vmatmul.mubr.f32.gmra.mrb[4].mxu1 %v515_v27  ;;  %v579_v27 = vld [vmem:[%s2052_s15 + $0x240] sm:$0xff] }
  0xaf   : > { %977 = vmatmul.mubr.f32.gmra.mrb[4].mxu0 %v517_v28  ;;  %797 = vmatprep.mubr.f32.mxu1 %v520_v29  ;;  %v581_v28 = vld [vmem:[%s2052_s15 + $0x250] sm:$0xff]  ;;  %v584_v29 = vld [vmem:[%s2052_s15 + $0x268] sm:$0xff] }
  0xb0   : > { %982 = vmatprep.mubr.f32.mxu0 %v522_v30  ;;  %v586_v30 = vld [vmem:[%s2052_s15 + $0x278] sm:$0xff] }
  0xb2   : > { %798 = vmatmul.mubr.f32.gmra.mrb[6].mxu1 %v519_v31  ;;  %v583_v31 = vld [vmem:[%s2052_s15 + $0x260] sm:$0xff] }
  0xb3   : > { %983 = vmatmul.mubr.f32.gmra.mrb[6].mxu0 %v521_v32  ;;  %803 = vmatprep.mubr.f32.mxu1 %v524_v33  ;;  %v585_v32 = vld [vmem:[%s2052_s15 + $0x270] sm:$0xff] }
  0xb4   : > { %988 = vmatprep.mubr.f32.mxu0 %v526_v34  ;;  %v467_v34 = vld [vmem:[#allocation2] sm:$0xff] }
  0xb6   : > { %804 = vmatmul.mubr.f32.gmra.mrb[8].mxu1 %v523_v35 }
  0xb7   : > { %989 = vmatmul.mubr.f32.gmra.mrb[8].mxu0 %v525_v36  ;;  %809 = vmatprep.mubr.f32.mxu1 %v528_v37 }
  0xb8   : > { %994 = vmatprep.mubr.f32.mxu0 %v530_v38  ;;  %v468_v38 = vld [vmem:[#allocation2 + $0x8] sm:$0xff] }
  0xba   : > { %810 = vmatmul.mubr.f32.gmra.mrb[10].mxu1 %v527_v39 }
  0xbb   : > { %995 = vmatmul.mubr.f32.gmra.mrb[10].mxu0 %v529_v40  ;;  %815 = vmatprep.mubr.f32.mxu1 %v532_v41 }
  0xbc   : > { %1000 = vmatprep.mubr.f32.mxu0 %v534_v42 }
  0xbe   : > { %816 = vmatmul.mubr.f32.gmra.mrb[12].mxu1 %v531_v43 }
  0xbf   : > { %1001 = vmatmul.mubr.f32.gmra.mrb[12].mxu0 %v533_v44  ;;  %821 = vmatprep.mubr.f32.mxu1 %v536_v45  ;;  %v469_v44 = vld [vmem:[#allocation2 + $0x10] sm:$0xff] }
  0xc0   : > { %1006 = vmatprep.mubr.f32.mxu0 %v538_v46 }
  0xc2   : > { %822 = vmatmul.mubr.f32.gmra.mrb[14].mxu1 %v535_v47 }
  0xc3   : > { %1007 = vmatmul.mubr.f32.gmra.mrb[14].mxu0 %v537_v48  ;;  %827 = vmatprep.mubr.f32.mxu1 %v540_v49  ;;  %v470_v48 = vld [vmem:[#allocation2 + $0x18] sm:$0xff] }
  0xc4   : > { %1012 = vmatprep.mubr.f32.mxu0 %v542_v50 }
  0xc6   : > { %828 = vmatmul.mubr.f32.gmra.mrb[16].mxu1 %v539_v51 }
  0xc7   : > { %1013 = vmatmul.mubr.f32.gmra.mrb[16].mxu0 %v541_v52  ;;  %833 = vmatprep.mubr.f32.mxu1 %v544_v53 }
  0xc8   : > { %1018 = vmatprep.mubr.f32.mxu0 %v546_v54  ;;  %v471_v54 = vld [vmem:[#allocation2 + $0x20] sm:$0xff] }
  0xca   : > { %834 = vmatmul.mubr.f32.gmra.mrb[18].mxu1 %v543_v55 }
  0xcb   : > { %1019 = vmatmul.mubr.f32.gmra.mrb[18].mxu0 %v545_v56  ;;  %839 = vmatprep.mubr.f32.mxu1 %v548_v57 }
  0xcc   : > { %1024 = vmatprep.mubr.f32.mxu0 %v550_v58  ;;  %v472_v58 = vld [vmem:[#allocation2 + $0x28] sm:$0xff] }
  0xce   : > { %840 = vmatmul.mubr.f32.gmra.mrb[20].mxu1 %v547_v59 }
  0xcf   : > { %1025 = vmatmul.mubr.f32.gmra.mrb[20].mxu0 %v549_v60  ;;  %845 = vmatprep.mubr.f32.mxu1 %v552_v61 }
  0xd0   : > { %1030 = vmatprep.mubr.f32.mxu0 %v554_v62 }
  0xd2   : > { %846 = vmatmul.mubr.f32.gmra.mrb[22].mxu1 %v551_v63 }
  0xd3   : > { %1031 = vmatmul.mubr.f32.gmra.mrb[22].mxu0 %v553_v0  ;;  %851 = vmatprep.mubr.f32.mxu1 %v556_v1  ;;  %v473_v0 = vld [vmem:[#allocation2 + $0x30] sm:$0xff] }
  0xd4   : > { %1036 = vmatprep.mubr.f32.mxu0 %v558_v2 }
  0xd6   : > { %852 = vmatmul.mubr.f32.gmra.mrb[24].mxu1 %v555_v3 }
  0xd7   : > { %1037 = vmatmul.mubr.f32.gmra.mrb[24].mxu0 %v557_v4  ;;  %857 = vmatprep.mubr.f32.mxu1 %v560_v5  ;;  %v474_v4 = vld [vmem:[#allocation2 + $0x38] sm:$0xff] }
  0xd8   : > { %1042 = vmatprep.mubr.f32.mxu0 %v562_v6 }
  0xda   : > { %858 = vmatmul.mubr.f32.gmra.mrb[26].mxu1 %v559_v7 }
  0xdb   : > { %1043 = vmatmul.mubr.f32.gmra.mrb[26].mxu0 %v561_v8  ;;  %863 = vmatprep.mubr.f32.mxu1 %v564_v9 }
  0xdc   : > { %1048 = vmatprep.mubr.f32.mxu0 %v566_v10  ;;  %v475_v10 = vld [vmem:[#allocation2 + $0x40] sm:$0xff] }
  0xde   : > { %864 = vmatmul.mubr.f32.gmra.mrb[28].mxu1 %v563_v11 }
  0xdf   : > { %1049 = vmatmul.mubr.f32.gmra.mrb[28].mxu0 %v565_v12  ;;  %869 = vmatprep.mubr.f32.mxu1 %v568_v13 }
  0xe0   : > { %1054 = vmatprep.mubr.f32.mxu0 %v570_v14  ;;  %v476_v14 = vld [vmem:[#allocation2 + $0x48] sm:$0xff] }
  0xe2   : > { %870 = vmatmul.mubr.f32.gmra.mrb[30].mxu1 %v567_v15 }
  0xe3   : > { %1055 = vmatmul.mubr.f32.gmra.mrb[30].mxu0 %v569_v16  ;;  %875 = vmatprep.mubr.f32.mxu1 %v572_v17 }
  0xe4   : > { %1060 = vmatprep.mubr.f32.mxu0 %v574_v18 }
  0xe6   : > { %876 = vmatmul.mubr.f32.gmra.mrb[32].mxu1 %v571_v19 }
  0xe7   : > { %1061 = vmatmul.mubr.f32.gmra.mrb[32].mxu0 %v573_v20  ;;  %881 = vmatprep.mubr.f32.mxu1 %v576_v21  ;;  %v477_v20 = vld [vmem:[#allocation2 + $0x50] sm:$0xff] }
  0xe8   : > { %1066 = vmatprep.mubr.f32.mxu0 %v578_v22 }
  0xea   : > { %882 = vmatmul.mubr.f32.gmra.mrb[34].mxu1 %v575_v23 }
  0xeb   : > { %1067 = vmatmul.mubr.f32.gmra.mrb[34].mxu0 %v577_v24  ;;  %887 = vmatprep.mubr.f32.mxu1 %v580_v25  ;;  %v478_v24 = vld [vmem:[#allocation2 + $0x58] sm:$0xff] }
  0xec   : > { %1072 = vmatprep.mubr.f32.mxu0 %v582_v26 }
  0xee   : > { %888 = vmatmul.mubr.f32.gmra.mrb[36].mxu1 %v579_v27 }
  0xef   : > { %1073 = vmatmul.mubr.f32.gmra.mrb[36].mxu0 %v581_v28  ;;  %893 = vmatprep.mubr.f32.mxu1 %v584_v29 }
  0xf0   : > { %1078 = vmatprep.mubr.f32.mxu0 %v586_v30  ;;  %v479_v30 = vld [vmem:[#allocation2 + $0x60] sm:$0xff] }
  0xf2   : > { %894 = vmatmul.mubr.f32.gmra.mrb[38].mxu1 %v583_v31 }
  0xf3   : > { %1079 = vmatmul.mubr.f32.gmra.mrb[38].mxu0 %v585_v32 }
 0x179   : > { %v781_v33 = vpop.f32.mrb[0].mxu1 }
 0x17a   : > { %v966_v35 = vpop.f32.mrb[0].mxu0  ;;  %v783_v36 = vpop.f32.mrb[1].mxu1 }
 0x17b   : > { %v967_v37 = vadd.f32 %v966_v35, %v781_v33  ;;  %v968_v39 = vpop.f32.mrb[1].mxu0 }
 0x17c   : > { %v969_v40 = vadd.f32 %v968_v39, %v783_v36 }
 0x17d   : > { %v1085_v41 = vadd.f32 %v967_v37, %v467_v34  ;;  %v787_v42 = vpop.f32.mrb[2].mxu1  ;;  %v480_v34 = vld [vmem:[#allocation2 + $0x68] sm:$0xff] }
 0x17e   : > { %v1086_v43 = vadd.f32 %v969_v40, %v468_v38  ;;  %v972_v45 = vpop.f32.mrb[2].mxu0  ;;  %v789_v46 = vpop.f32.mrb[3].mxu1  ;;  %v481_v40 = vld [vmem:[#allocation2 + $0x70] sm:$0xff] }
 0x17f   : > { %1125 = vst [vmem:[#allocation2] sm:$0xff] %v1085_v41  ;;  %v973_v47 = vadd.f32 %v972_v45, %v787_v42  ;;  %v974_v49 = vpop.f32.mrb[3].mxu0 }
 0x180   : > { %1126 = vst [vmem:[#allocation2 + $0x8] sm:$0xff] %v1086_v43  ;;  %v975_v50 = vadd.f32 %v974_v49, %v789_v46 }
 0x181   : > { %v1087_v51 = vadd.f32 %v973_v47, %v469_v44  ;;  %v793_v52 = vpop.f32.mrb[4].mxu1  ;;  %v482_v44 = vld [vmem:[#allocation2 + $0x78] sm:$0xff] }
 0x182   : > { %v1088_v53 = vadd.f32 %v975_v50, %v470_v48  ;;  %v978_v55 = vpop.f32.mrb[4].mxu0  ;;  %v795_v56 = vpop.f32.mrb[5].mxu1  ;;  %v483_v50 = vld [vmem:[#allocation2 + $0x80] sm:$0xff] }
 0x183   : > { %1127 = vst [vmem:[#allocation2 + $0x10] sm:$0xff] %v1087_v51  ;;  %v979_v57 = vadd.f32 %v978_v55, %v793_v52  ;;  %v980_v59 = vpop.f32.mrb[5].mxu0 }
 0x184   : > { %1128 = vst [vmem:[#allocation2 + $0x18] sm:$0xff] %v1088_v53  ;;  %v981_v60 = vadd.f32 %v980_v59, %v795_v56 }
 0x185   : > { %v1089_v61 = vadd.f32 %v979_v57, %v471_v54  ;;  %v799_v62 = vpop.f32.mrb[6].mxu1  ;;  %v484_v54 = vld [vmem:[#allocation2 + $0x88] sm:$0xff] }
 0x186   : > { %v1090_v63 = vadd.f32 %v981_v60, %v472_v58  ;;  %v984_v1 = vpop.f32.mrb[6].mxu0  ;;  %v801_v2 = vpop.f32.mrb[7].mxu1  ;;  %v485_v60 = vld [vmem:[#allocation2 + $0x90] sm:$0xff] }
 0x187   : > { %1129 = vst [vmem:[#allocation2 + $0x20] sm:$0xff] %v1089_v61  ;;  %v985_v3 = vadd.f32 %v984_v1, %v799_v62  ;;  %v986_v5 = vpop.f32.mrb[7].mxu0 }
 0x188   : > { %1130 = vst [vmem:[#allocation2 + $0x28] sm:$0xff] %v1090_v63  ;;  %v987_v6 = vadd.f32 %v986_v5, %v801_v2 }
 0x189   : > { %v1091_v7 = vadd.f32 %v985_v3, %v473_v0  ;;  %v805_v8 = vpop.f32.mrb[8].mxu1  ;;  %v486_v0 = vld [vmem:[#allocation2 + $0x98] sm:$0xff] }
 0x18a   : > { %v1092_v9 = vadd.f32 %v987_v6, %v474_v4  ;;  %v990_v11 = vpop.f32.mrb[8].mxu0  ;;  %v807_v12 = vpop.f32.mrb[9].mxu1  ;;  %v487_v6 = vld [vmem:[#allocation2 + $0xa0] sm:$0xff] }
 0x18b   : > { %1131 = vst [vmem:[#allocation2 + $0x30] sm:$0xff] %v1091_v7  ;;  %v991_v13 = vadd.f32 %v990_v11, %v805_v8  ;;  %v992_v15 = vpop.f32.mrb[9].mxu0 }
 0x18c   : > { %1132 = vst [vmem:[#allocation2 + $0x38] sm:$0xff] %v1092_v9  ;;  %v993_v16 = vadd.f32 %v992_v15, %v807_v12 }
 0x18d   : > { %v1093_v17 = vadd.f32 %v991_v13, %v475_v10  ;;  %v811_v18 = vpop.f32.mrb[10].mxu1  ;;  %v488_v10 = vld [vmem:[#allocation2 + $0xa8] sm:$0xff] }
 0x18e   : > { %v1094_v19 = vadd.f32 %v993_v16, %v476_v14  ;;  %v996_v21 = vpop.f32.mrb[10].mxu0  ;;  %v813_v22 = vpop.f32.mrb[11].mxu1  ;;  %v489_v16 = vld [vmem:[#allocation2 + $0xb0] sm:$0xff] }
 0x18f   : > { %1133 = vst [vmem:[#allocation2 + $0x40] sm:$0xff] %v1093_v17  ;;  %v997_v23 = vadd.f32 %v996_v21, %v811_v18  ;;  %v998_v25 = vpop.f32.mrb[11].mxu0 }
 0x190   : > { %1134 = vst [vmem:[#allocation2 + $0x48] sm:$0xff] %v1094_v19  ;;  %v999_v26 = vadd.f32 %v998_v25, %v813_v22 }
 0x191   : > { %v1095_v27 = vadd.f32 %v997_v23, %v477_v20  ;;  %v817_v28 = vpop.f32.mrb[12].mxu1  ;;  %v490_v20 = vld [vmem:[#allocation2 + $0xb8] sm:$0xff] }
 0x192   : > { %v1096_v29 = vadd.f32 %v999_v26, %v478_v24  ;;  %v1002_v31 = vpop.f32.mrb[12].mxu0  ;;  %v819_v32 = vpop.f32.mrb[13].mxu1  ;;  %v491_v26 = vld [vmem:[#allocation2 + $0xc0] sm:$0xff] }
 0x193   : > { %1135 = vst [vmem:[#allocation2 + $0x50] sm:$0xff] %v1095_v27  ;;  %v1003_v33 = vadd.f32 %v1002_v31, %v817_v28  ;;  %v1004_v35 = vpop.f32.mrb[13].mxu0 }
 0x194   : > { %1136 = vst [vmem:[#allocation2 + $0x58] sm:$0xff] %v1096_v29  ;;  %v1005_v36 = vadd.f32 %v1004_v35, %v819_v32 }
 0x195   : > { %v1097_v37 = vadd.f32 %v1003_v33, %v479_v30  ;;  %v823_v38 = vpop.f32.mrb[14].mxu1  ;;  %v492_v30 = vld [vmem:[#allocation2 + $0xc8] sm:$0xff] }
 0x196   : > { %v1098_v39 = vadd.f32 %v1005_v36, %v480_v34  ;;  %v1008_v41 = vpop.f32.mrb[14].mxu0  ;;  %v825_v42 = vpop.f32.mrb[15].mxu1  ;;  %v493_v36 = vld [vmem:[#allocation2 + $0xd0] sm:$0xff] }
 0x197   : > { %1137 = vst [vmem:[#allocation2 + $0x60] sm:$0xff] %v1097_v37  ;;  %v1009_v43 = vadd.f32 %v1008_v41, %v823_v38  ;;  %v1010_v45 = vpop.f32.mrb[15].mxu0 }
 0x198   : > { %1138 = vst [vmem:[#allocation2 + $0x68] sm:$0xff] %v1098_v39  ;;  %v1011_v46 = vadd.f32 %v1010_v45, %v825_v42 }
 0x199   : > { %v1099_v47 = vadd.f32 %v1009_v43, %v481_v40  ;;  %v829_v48 = vpop.f32.mrb[16].mxu1  ;;  %v494_v40 = vld [vmem:[#allocation2 + $0xd8] sm:$0xff] }
 0x19a   : > { %v1100_v49 = vadd.f32 %v1011_v46, %v482_v44  ;;  %v1014_v51 = vpop.f32.mrb[16].mxu0  ;;  %v831_v52 = vpop.f32.mrb[17].mxu1  ;;  %v495_v46 = vld [vmem:[#allocation2 + $0xe0] sm:$0xff] }
 0x19b   : > { %1139 = vst [vmem:[#allocation2 + $0x70] sm:$0xff] %v1099_v47  ;;  %v1015_v53 = vadd.f32 %v1014_v51, %v829_v48  ;;  %v1016_v55 = vpop.f32.mrb[17].mxu0 }
 0x19c   : > { %1140 = vst [vmem:[#allocation2 + $0x78] sm:$0xff] %v1100_v49  ;;  %v1017_v56 = vadd.f32 %v1016_v55, %v831_v52 }
 0x19d   : > { %v1101_v57 = vadd.f32 %v1015_v53, %v483_v50  ;;  %v835_v58 = vpop.f32.mrb[18].mxu1  ;;  %v496_v50 = vld [vmem:[#allocation2 + $0xe8] sm:$0xff] }
 0x19e   : > { %v1102_v59 = vadd.f32 %v1017_v56, %v484_v54  ;;  %v1020_v61 = vpop.f32.mrb[18].mxu0  ;;  %v837_v62 = vpop.f32.mrb[19].mxu1  ;;  %v497_v56 = vld [vmem:[#allocation2 + $0xf0] sm:$0xff] }
 0x19f   : > { %1141 = vst [vmem:[#allocation2 + $0x80] sm:$0xff] %v1101_v57  ;;  %v1021_v63 = vadd.f32 %v1020_v61, %v835_v58  ;;  %v1022_v1 = vpop.f32.mrb[19].mxu0 }
 0x1a0   : > { %1142 = vst [vmem:[#allocation2 + $0x88] sm:$0xff] %v1102_v59  ;;  %v1023_v2 = vadd.f32 %v1022_v1, %v837_v62 }
 0x1a1   : > { %v1103_v3 = vadd.f32 %v1021_v63, %v485_v60  ;;  %v841_v4 = vpop.f32.mrb[20].mxu1  ;;  %v498_v60 = vld [vmem:[#allocation2 + $0xf8] sm:$0xff] }
 0x1a2   : > { %v1104_v5 = vadd.f32 %v1023_v2, %v486_v0  ;;  %v1026_v7 = vpop.f32.mrb[20].mxu0  ;;  %v843_v8 = vpop.f32.mrb[21].mxu1  ;;  %v499_v2 = vld [vmem:[#allocation2 + $0x100] sm:$0xff] }
 0x1a3   : > { %1143 = vst [vmem:[#allocation2 + $0x90] sm:$0xff] %v1103_v3  ;;  %v1027_v9 = vadd.f32 %v1026_v7, %v841_v4  ;;  %v1028_v11 = vpop.f32.mrb[21].mxu0 }
 0x1a4   : > { %1144 = vst [vmem:[#allocation2 + $0x98] sm:$0xff] %v1104_v5  ;;  %v1029_v12 = vadd.f32 %v1028_v11, %v843_v8 }
 0x1a5   : > { %v1105_v13 = vadd.f32 %v1027_v9, %v487_v6  ;;  %v847_v14 = vpop.f32.mrb[22].mxu1  ;;  %v500_v6 = vld [vmem:[#allocation2 + $0x108] sm:$0xff] }
 0x1a6   : > { %v1106_v15 = vadd.f32 %v1029_v12, %v488_v10  ;;  %v1032_v17 = vpop.f32.mrb[22].mxu0  ;;  %v849_v18 = vpop.f32.mrb[23].mxu1  ;;  %v501_v12 = vld [vmem:[#allocation2 + $0x110] sm:$0xff] }
 0x1a7   : > { %1145 = vst [vmem:[#allocation2 + $0xa0] sm:$0xff] %v1105_v13  ;;  %v1033_v19 = vadd.f32 %v1032_v17, %v847_v14  ;;  %v1034_v21 = vpop.f32.mrb[23].mxu0 }
 0x1a8   : > { %1146 = vst [vmem:[#allocation2 + $0xa8] sm:$0xff] %v1106_v15  ;;  %v1035_v22 = vadd.f32 %v1034_v21, %v849_v18 }
 0x1a9   : > { %v1107_v23 = vadd.f32 %v1033_v19, %v489_v16  ;;  %v853_v24 = vpop.f32.mrb[24].mxu1  ;;  %v502_v16 = vld [vmem:[#allocation2 + $0x118] sm:$0xff] }
 0x1aa   : > { %v1108_v25 = vadd.f32 %v1035_v22, %v490_v20  ;;  %v1038_v27 = vpop.f32.mrb[24].mxu0  ;;  %v855_v28 = vpop.f32.mrb[25].mxu1  ;;  %v503_v22 = vld [vmem:[#allocation2 + $0x120] sm:$0xff] }
 0x1ab   : > { %1147 = vst [vmem:[#allocation2 + $0xb0] sm:$0xff] %v1107_v23  ;;  %v1039_v29 = vadd.f32 %v1038_v27, %v853_v24  ;;  %v1040_v31 = vpop.f32.mrb[25].mxu0 }
 0x1ac   : > { %1148 = vst [vmem:[#allocation2 + $0xb8] sm:$0xff] %v1108_v25  ;;  %v1041_v32 = vadd.f32 %v1040_v31, %v855_v28 }
 0x1ad   : > { %v1109_v33 = vadd.f32 %v1039_v29, %v491_v26  ;;  %v859_v34 = vpop.f32.mrb[26].mxu1  ;;  %v504_v26 = vld [vmem:[#allocation2 + $0x128] sm:$0xff] }
 0x1ae   : > { %v1110_v35 = vadd.f32 %v1041_v32, %v492_v30  ;;  %v1044_v37 = vpop.f32.mrb[26].mxu0  ;;  %v861_v38 = vpop.f32.mrb[27].mxu1  ;;  %v505_v32 = vld [vmem:[#allocation2 + $0x130] sm:$0xff] }
 0x1af   : > { %1149 = vst [vmem:[#allocation2 + $0xc0] sm:$0xff] %v1109_v33  ;;  %v1045_v39 = vadd.f32 %v1044_v37, %v859_v34  ;;  %v1046_v41 = vpop.f32.mrb[27].mxu0 }
 0x1b0   : > { %1150 = vst [vmem:[#allocation2 + $0xc8] sm:$0xff] %v1110_v35  ;;  %v1047_v42 = vadd.f32 %v1046_v41, %v861_v38  ;;  %v1211_v41 = vlaneseq (!%p1497_p13) }
 0x1b1   : > { %v1111_v43 = vadd.f32 %v1045_v39, %v493_v36  ;;  %v865_v44 = vpop.f32.mrb[28].mxu1  ;;  %v506_v36 = vld [vmem:[#allocation2 + $0x138] sm:$0xff] }
 0x1b2   : > { %v1112_v45 = vadd.f32 %v1047_v42, %v494_v40  ;;  %v1050_v47 = vpop.f32.mrb[28].mxu0  ;;  %v867_v48 = vpop.f32.mrb[29].mxu1  ;;  %v1212_v42 = vshrl.u32 (!%p1497_p13), %v1211_v41, 7  ;;  %v1187_v41 = vld [vmem:[#allocation2 + $0x90] sm:$0xff] (!%p1497_p13) }
 0x1b3   : > { %1151 = vst [vmem:[#allocation2 + $0xd0] sm:$0xff] %v1111_v43  ;;  %v1051_v49 = vadd.f32 %v1050_v47, %v865_v44  ;;  %v1052_v51 = vpop.f32.mrb[29].mxu0  ;;  %v1209_v43 = vld [vmem:[%s2421_s2] sm:$0x3] (!%p1497_p13)  ;;  %v1170_v47 = vld [vmem:[#allocation2 + $0x8] sm:$0xff] (!%p1497_p13) }
 0x1b4   : > { %1152 = vst [vmem:[#allocation2 + $0xd8] sm:$0xff] %v1112_v45  ;;  %v1053_v52 = vadd.f32 %v1052_v51, %v867_v48  ;;  %v1261_v44 = vld [vmem:[%s2422_s3] sm:$0x3] (!%p1497_p13)  ;;  %v1217_v48 = vsub.s32 (!%p1497_p13), 1, %v1212_v42 }
 0x1b5   : > { %v1113_v53 = vadd.f32 %v1051_v49, %v495_v46  ;;  %v871_v54 = vpop.f32.mrb[30].mxu1  ;;  %v1169_v45 = vld [vmem:[#allocation2] sm:$0xff] (!%p1497_p13)  ;;  %v1213_v46 = vsub.s32 (!%p1497_p13), 0, %v1212_v42  ;;  %v1171_v49 = vld [vmem:[#allocation2 + $0x10] sm:$0xff] (!%p1497_p13) }
 0x1b6   : > { %v1114_v55 = vadd.f32 %v1053_v52, %v496_v50  ;;  %v1056_v57 = vpop.f32.mrb[30].mxu0  ;;  %v873_v58 = vpop.f32.mrb[31].mxu1  ;;  %v1172_v50 = vld [vmem:[#allocation2 + $0x18] sm:$0xff] (!%p1497_p13)  ;;  %v1173_v51 = vld [vmem:[#allocation2 + $0x20] sm:$0xff] (!%p1497_p13) }
 0x1b7   : > { %1153 = vst [vmem:[#allocation2 + $0xe0] sm:$0xff] %v1113_v53  ;;  %v1057_v59 = vadd.f32 %v1056_v57, %v871_v54  ;;  %v1058_v61 = vpop.f32.mrb[31].mxu0  ;;  %v2270_v52 = vrot.slane (!%p1497_p13), %v1209_v43, %v1213_v46  ;;  %v2272_v53 = vrot.slane (!%p1497_p13), %v1261_v44, %v1213_v46  ;;  %v2274_v54 = vrot.slane (!%p1497_p13), %v1209_v43, %v1217_v48  ;;  %v1175_v57 = vld [vmem:[#allocation2 + $0x30] sm:$0xff] (!%p1497_p13)  ;;  %v1188_v46 = vld [vmem:[#allocation2 + $0x98] sm:$0xff] (!%p1497_p13) }
 0x1b8   : > { %1154 = vst [vmem:[#allocation2 + $0xe8] sm:$0xff] %v1114_v55  ;;  %v1059_v62 = vadd.f32 %v1058_v61, %v873_v58  ;;  %v2276_v55 = vrot.slane (!%p1497_p13), %v1261_v44, %v1217_v48  ;;  %v1176_v58 = vld [vmem:[#allocation2 + $0x38] sm:$0xff] (!%p1497_p13)  ;;  %v1190_v48 = vld [vmem:[#allocation2 + $0xa8] sm:$0xff] (!%p1497_p13) }
 0x1b9   : > { %v1115_v63 = vadd.f32 %v1057_v59, %v497_v56  ;;  %v877_v0 = vpop.f32.mrb[32].mxu1  ;;  %v1174_v56 = vld [vmem:[#allocation2 + $0x28] sm:$0xff] (!%p1497_p13)  ;;  %v1221_v59 = vmul.f32 (!%p1497_p13), %v2270_v52, %v1169_v45  ;;  %v1223_v61 = vmul.f32 (!%p1497_p13), %v2270_v52, %v1171_v49 }
 0x1ba   : > { %v1116_v1 = vadd.f32 %v1059_v62, %v498_v60  ;;  %v1062_v3 = vpop.f32.mrb[32].mxu0  ;;  %v879_v4 = vpop.f32.mrb[33].mxu1  ;;  %v1222_v60 = vmul.f32 (!%p1497_p13), %v2274_v54, %v1170_v47  ;;  %v1224_v62 = vmul.f32 (!%p1497_p13), %v2274_v54, %v1172_v50  ;;  %v1189_v47 = vld [vmem:[#allocation2 + $0xa0] sm:$0xff] (!%p1497_p13) }
 0x1bb   : > { %1155 = vst [vmem:[#allocation2 + $0xf0] sm:$0xff] %v1115_v63  ;;  %v1063_v5 = vadd.f32 %v1062_v3, %v877_v0  ;;  %v1064_v7 = vpop.f32.mrb[33].mxu0  ;;  %v1225_v63 = vmul.f32 (!%p1497_p13), %v2270_v52, %v1173_v51  ;;  %v1226_v0 = vmul.f32 (!%p1497_p13), %v2274_v54, %v1174_v56  ;;  %v1273_v3 = vadd.f32 (!%p1497_p13), %v2272_v53, %v1221_v59 }
 0x1bc   : > { %1156 = vst [vmem:[#allocation2 + $0xf8] sm:$0xff] %v1116_v1  ;;  %v1065_v8 = vadd.f32 %v1064_v7, %v879_v4  ;;  %v1227_v1 = vmul.f32 (!%p1497_p13), %v2270_v52, %v1175_v57  ;;  %v1274_v4 = vadd.f32 (!%p1497_p13), %v2276_v55, %v1222_v60  ;;  %v1177_v7 = vld [vmem:[#allocation2 + $0x40] sm:$0xff] (!%p1497_p13)  ;;  %v1191_v57 = vld [vmem:[#allocation2 + $0xb0] sm:$0xff] (!%p1497_p13) }
 0x1bd   : > { %v1117_v9 = vadd.f32 %v1063_v5, %v499_v2  ;;  %v883_v10 = vpop.f32.mrb[34].mxu1  ;;  %v1228_v2 = vmul.f32 (!%p1497_p13), %v2274_v54, %v1176_v58  ;;  %v1275_v5 = vadd.f32 (!%p1497_p13), %v2272_v53, %v1223_v61  ;;  %v1192_v58 = vld [vmem:[#allocation2 + $0xb8] sm:$0xff] (!%p1497_p13) }
 0x1be   : > { %v1118_v11 = vadd.f32 %v1065_v8, %v500_v6  ;;  %v1068_v13 = vpop.f32.mrb[34].mxu0  ;;  %v885_v14 = vpop.f32.mrb[35].mxu1  ;;  %v1276_v6 = vadd.f32 (!%p1497_p13), %v2276_v55, %v1224_v62  ;;  %v1178_v8 = vld [vmem:[#allocation2 + $0x48] sm:$0xff] (!%p1497_p13) }
 0x1bf   : > { %1157 = vst [vmem:[#allocation2 + $0x100] sm:$0xff] %v1117_v9  ;;  %v1069_v15 = vadd.f32 %v1068_v13, %v883_v10  ;;  %v1070_v17 = vpop.f32.mrb[35].mxu0  ;;  %v1179_v9 = vld [vmem:[#allocation2 + $0x50] sm:$0xff] (!%p1497_p13)  ;;  %v1277_v10 = vadd.f32 (!%p1497_p13), %v2272_v53, %v1225_v63  ;;  %v1280_v13 = vadd.f32 (!%p1497_p13), %v2276_v55, %v1228_v2  ;;  %v1240_v2 = vmul.f32 (!%p1497_p13), %v2274_v54, %v1188_v46 }
 0x1c0   : > { %1158 = vst [vmem:[#allocation2 + $0x108] sm:$0xff] %v1118_v11  ;;  %v1071_v18 = vadd.f32 %v1070_v17, %v885_v14  ;;  %v1278_v11 = vadd.f32 (!%p1497_p13), %v2276_v55, %v1226_v0  ;;  %v1180_v14 = vld [vmem:[#allocation2 + $0x58] sm:$0xff] (!%p1497_p13)  ;;  %v1313_v17 = vmax.f32 (!%p1497_p13), %v1273_v3, 0.0  ;;  %v1241_v3 = vmul.f32 (!%p1497_p13), %v2270_v52, %v1189_v47 }
 0x1c1   : > { %v1119_v19 = vadd.f32 %v1069_v15, %v501_v12  ;;  %v889_v20 = vpop.f32.mrb[36].mxu1  ;;  %v1279_v12 = vadd.f32 (!%p1497_p13), %v2272_v53, %v1227_v1  ;;  %v1181_v15 = vld [vmem:[#allocation2 + $0x60] sm:$0xff] (!%p1497_p13)  ;;  %v1239_v1 = vmul.f32 (!%p1497_p13), %v2270_v52, %v1187_v41 }
 0x1c2   : > { %v1120_v21 = vadd.f32 %v1071_v18, %v502_v16  ;;  %v1074_v23 = vpop.f32.mrb[36].mxu0  ;;  %v891_v24 = vpop.f32.mrb[37].mxu1  ;;  %v1182_v16 = vld [vmem:[#allocation2 + $0x68] sm:$0xff] (!%p1497_p13)  ;;  %v1314_v18 = vmax.f32 (!%p1497_p13), %v1274_v4, 0.0  ;;  %1353 = vst [vmem:[%s2050_s8] sm:$0xff] (!%p1497_p13), %v1313_v17  ;;  %v1242_v4 = vmul.f32 (!%p1497_p13), %v2274_v54, %v1190_v48 }
 0x1c3   : > { %1159 = vst [vmem:[#allocation2 + $0x110] sm:$0xff] %v1119_v19  ;;  %v1075_v25 = vadd.f32 %v1074_v23, %v889_v20  ;;  %v1076_v27 = vpop.f32.mrb[37].mxu0  ;;  %v1315_v19 = vmax.f32 (!%p1497_p13), %v1275_v5, 0.0  ;;  %v1316_v20 = vmax.f32 (!%p1497_p13), %v1276_v6, 0.0  ;;  %v1317_v23 = vmax.f32 (!%p1497_p13), %v1277_v10, 0.0 }
 0x1c4   : > { %1160 = vst [vmem:[#allocation2 + $0x118] sm:$0xff] %v1120_v21  ;;  %v1077_v28 = vadd.f32 %v1076_v27, %v891_v24  ;;  %v1183_v21 = vld [vmem:[#allocation2 + $0x70] sm:$0xff] (!%p1497_p13)  ;;  %v1318_v24 = vmax.f32 (!%p1497_p13), %v1278_v11, 0.0  ;;  %1354 = vst [vmem:[%s2050_s8 + $0x8] sm:$0xff] (!%p1497_p13), %v1314_v18  ;;  %v1229_v27 = vmul.f32 (!%p1497_p13), %v2270_v52, %v1177_v7  ;;  %v1243_v5 = vmul.f32 (!%p1497_p13), %v2270_v52, %v1191_v57  ;;  %v1193_v11 = vld [vmem:[#allocation2 + $0xc0] sm:$0xff] (!%p1497_p13) }
 0x1c5   : > { %v1121_v29 = vadd.f32 %v1075_v25, %v503_v22  ;;  %v895_v30 = vpop.f32.mrb[38].mxu1  ;;  %v1184_v22 = vld [vmem:[#allocation2 + $0x78] sm:$0xff] (!%p1497_p13)  ;;  %v1319_v25 = vmax.f32 (!%p1497_p13), %v1279_v12, 0.0  ;;  %1355 = vst [vmem:[%s2050_s8 + $0x10] sm:$0xff] (!%p1497_p13), %v1315_v19  ;;  %1356 = vst [vmem:[%s2050_s8 + $0x18] sm:$0xff] (!%p1497_p13), %v1316_v20  ;;  %v1244_v6 = vmul.f32 (!%p1497_p13), %v2274_v54, %v1192_v58  ;;  %v1292_v10 = vadd.f32 (!%p1497_p13), %v2276_v55, %v1240_v2  ;;  %v1194_v12 = vld [vmem:[#allocation2 + $0xc8] sm:$0xff] (!%p1497_p13) }
 0x1c6   : > { %v1122_v31 = vadd.f32 %v1077_v28, %v504_v26  ;;  %v1080_v33 = vpop.f32.mrb[38].mxu0  ;;  %v897_v34 = vpop.f32.mrb[39].mxu1  ;;  %1168 = sbr.rel (%p1497_p13) target bundleno = 484 (0x1e4), region = 67  ;;  %v1320_v26 = vmax.f32 (!%p1497_p13), %v1280_v13, 0.0  ;;  %v1230_v28 = vmul.f32 (!%p1497_p13), %v2274_v54, %v1178_v8  ;;  %1357 = vst [vmem:[%s2050_s8 + $0x20] sm:$0xff] (!%p1497_p13), %v1317_v23  ;;  %1358 = vst [vmem:[%s2050_s8 + $0x28] sm:$0xff] (!%p1497_p13), %v1318_v24 }
 0x1c7   : > { %1161 = vst [vmem:[#allocation2 + $0x120] sm:$0xff] %v1121_v29  ;;  %v1081_v35 = vadd.f32 %v1080_v33, %v895_v30  ;;  %v1082_v37 = vpop.f32.mrb[39].mxu0  ;;  %v1231_v29 = vmul.f32 (!%p1497_p13), %v2270_v52, %v1179_v9  ;;  %v1232_v30 = vmul.f32 (!%p1497_p13), %v2274_v54, %v1180_v14  ;;  %1359 = vst [vmem:[%s2050_s8 + $0x30] sm:$0xff] (!%p1497_p13), %v1319_v25  ;;  %v1195_v13 = vld [vmem:[#allocation2 + $0xd0] sm:$0xff] (!%p1497_p13)  ;;  %v1196_v18 = vld [vmem:[#allocation2 + $0xd8] sm:$0xff] (!%p1497_p13)  ;;  %v1332_v24 = vmax.f32 (!%p1497_p13), %v1292_v10, 0.0 }
 0x1c8   : > { %1162 = vst [vmem:[#allocation2 + $0x128] sm:$0xff] %v1122_v31  ;;  %v1083_v38 = vadd.f32 %v1082_v37, %v897_v34  ;;  %1360 = vst [vmem:[%s2050_s8 + $0x38] sm:$0xff] (!%p1497_p13), %v1320_v26  ;;  %v1233_v31 = vmul.f32 (!%p1497_p13), %v2270_v52, %v1181_v15  ;;  %v1235_v33 = vmul.f32 (!%p1497_p13), %v2270_v52, %v1183_v21  ;;  %v1197_v19 = vld [vmem:[#allocation2 + $0xe0] sm:$0xff] (!%p1497_p13)  ;;  %v1198_v20 = vld [vmem:[#allocation2 + $0xe8] sm:$0xff] (!%p1497_p13) }
 0x1c9   : > { %v1123_v39 = vadd.f32 %v1081_v35, %v505_v32  ;;  %v1234_v32 = vmul.f32 (!%p1497_p13), %v2274_v54, %v1182_v16  ;;  %v1236_v34 = vmul.f32 (!%p1497_p13), %v2274_v54, %v1184_v22  ;;  %v1281_v35 = vadd.f32 (!%p1497_p13), %v2272_v53, %v1229_v27  ;;  %v1199_v25 = vld [vmem:[#allocation2 + $0xf0] sm:$0xff] (!%p1497_p13)  ;;  %v1200_v26 = vld [vmem:[#allocation2 + $0xf8] sm:$0xff] (!%p1497_p13)  ;;  %1372 = vst [vmem:[%s2050_s8 + $0x98] sm:$0xff] (!%p1497_p13), %v1332_v24 }
 0x1ca   : > { %v1124_v40 = vadd.f32 %v1083_v38, %v506_v36  ;;  %v1282_v36 = vadd.f32 (!%p1497_p13), %v2276_v55, %v1230_v28  ;;  %v1283_v37 = vadd.f32 (!%p1497_p13), %v2272_v53, %v1231_v29  ;;  %v1284_v38 = vadd.f32 (!%p1497_p13), %v2276_v55, %v1232_v30 }
 0x1cb   : > { %1163 = vst [vmem:[#allocation2 + $0x130] sm:$0xff] %v1123_v39  ;;  %v1185_v39 = vld [vmem:[#allocation2 + $0x80] sm:$0xff] (!%p1497_p13)  ;;  %v1285_v42 = vadd.f32 (!%p1497_p13), %v2272_v53, %v1233_v31  ;;  %v1286_v43 = vadd.f32 (!%p1497_p13), %v2276_v55, %v1234_v32  ;;  %v1287_v44 = vadd.f32 (!%p1497_p13), %v2272_v53, %v1235_v33  ;;  %v1288_v45 = vadd.f32 (!%p1497_p13), %v2276_v55, %v1236_v34 }
 0x1cc   : > { %1164 = vst [vmem:[#allocation2 + $0x138] sm:$0xff] %v1124_v40  ;;  %v1186_v40 = vld [vmem:[#allocation2 + $0x88] sm:$0xff] (!%p1497_p13)  ;;  %v1321_v49 = vmax.f32 (!%p1497_p13), %v1281_v35, 0.0  ;;  %v1322_v50 = vmax.f32 (!%p1497_p13), %v1282_v36, 0.0  ;;  %v1323_v51 = vmax.f32 (!%p1497_p13), %v1283_v37, 0.0  ;;  %v1324_v56 = vmax.f32 (!%p1497_p13), %v1284_v38, 0.0 }
 0x1cd   : > { %v1325_v59 = vmax.f32 %v1285_v42, 0.0  ;;  %v1326_v60 = vmax.f32 %v1286_v43, 0.0  ;;  %v1327_v61 = vmax.f32 %v1287_v44, 0.0  ;;  %v1328_v62 = vmax.f32 %v1288_v45, 0.0  ;;  %v1201_v43 = vld [vmem:[#allocation2 + $0x100] sm:$0xff]  ;;  %v1202_v44 = vld [vmem:[#allocation2 + $0x108] sm:$0xff] }
 0x1ce   : > { %1361 = vst [vmem:[%s2050_s8 + $0x40] sm:$0xff] %v1321_v49  ;;  %1362 = vst [vmem:[%s2050_s8 + $0x48] sm:$0xff] %v1322_v50  ;;  %v1237_v63 = vmul.f32 %v2270_v52, %v1185_v39  ;;  %v1238_v0 = vmul.f32 %v2274_v54, %v1186_v40  ;;  %v1291_v9 = vadd.f32 %v2272_v53, %v1239_v1  ;;  %v1203_v45 = vld [vmem:[#allocation2 + $0x110] sm:$0xff]  ;;  %v1204_v50 = vld [vmem:[#allocation2 + $0x118] sm:$0xff] }
 0x1cf   : > { %1363 = vst [vmem:[%s2050_s8 + $0x50] sm:$0xff] %v1323_v51  ;;  %1364 = vst [vmem:[%s2050_s8 + $0x58] sm:$0xff] %v1324_v56  ;;  %v1293_v14 = vadd.f32 %v2272_v53, %v1241_v3  ;;  %v1294_v15 = vadd.f32 %v2276_v55, %v1242_v4  ;;  %v1295_v16 = vadd.f32 %v2272_v53, %v1243_v5  ;;  %v1205_v51 = vld [vmem:[#allocation2 + $0x120] sm:$0xff]  ;;  %v1206_v56 = vld [vmem:[#allocation2 + $0x128] sm:$0xff] }
 0x1d0   : > { %1365 = vst [vmem:[%s2050_s8 + $0x60] sm:$0xff] %v1325_v59  ;;  %1366 = vst [vmem:[%s2050_s8 + $0x68] sm:$0xff] %v1326_v60  ;;  %v1289_v7 = vadd.f32 %v2272_v53, %v1237_v63  ;;  %v1290_v8 = vadd.f32 %v2276_v55, %v1238_v0  ;;  %v1296_v17 = vadd.f32 %v2276_v55, %v1244_v6  ;;  %v1331_v23 = vmax.f32 %v1291_v9, 0.0 }
 0x1d1   : > { %1367 = vst [vmem:[%s2050_s8 + $0x70] sm:$0xff] %v1327_v61  ;;  %1368 = vst [vmem:[%s2050_s8 + $0x78] sm:$0xff] %v1328_v62  ;;  %v1333_v27 = vmax.f32 %v1293_v14, 0.0  ;;  %v1334_v28 = vmax.f32 %v1294_v15, 0.0  ;;  %v1335_v29 = vmax.f32 %v1295_v16, 0.0  ;;  %v1245_v31 = vmul.f32 %v2270_v52, %v1193_v11 }
 0x1d2   : > { %v1329_v21 = vmax.f32 %v1289_v7, 0.0  ;;  %v1330_v22 = vmax.f32 %v1290_v8, 0.0  ;;  %v1336_v30 = vmax.f32 %v1296_v17, 0.0  ;;  %1371 = vst [vmem:[%s2050_s8 + $0x90] sm:$0xff] %v1331_v23  ;;  %v1246_v32 = vmul.f32 %v2274_v54, %v1194_v12  ;;  %v1207_v61 = vld [vmem:[#allocation2 + $0x130] sm:$0xff] }
 0x1d3   : > { %v1247_v33 = vmul.f32 %v2270_v52, %v1195_v13  ;;  %v1248_v34 = vmul.f32 %v2274_v54, %v1196_v18  ;;  %1373 = vst [vmem:[%s2050_s8 + $0xa0] sm:$0xff] %v1333_v27  ;;  %1374 = vst [vmem:[%s2050_s8 + $0xa8] sm:$0xff] %v1334_v28  ;;  %v1249_v35 = vmul.f32 %v2270_v52, %v1197_v19  ;;  %v1208_v62 = vld [vmem:[#allocation2 + $0x138] sm:$0xff] }
 0x1d4   : > { %1369 = vst [vmem:[%s2050_s8 + $0x80] sm:$0xff] %v1329_v21  ;;  %1370 = vst [vmem:[%s2050_s8 + $0x88] sm:$0xff] %v1330_v22  ;;  %v1250_v36 = vmul.f32 %v2274_v54, %v1198_v20  ;;  %v1251_v37 = vmul.f32 %v2270_v52, %v1199_v25  ;;  %v1252_v38 = vmul.f32 %v2274_v54, %v1200_v26 }
 0x1d5   : > { %1375 = vst [vmem:[%s2050_s8 + $0xb0] sm:$0xff] %v1335_v29  ;;  %1376 = vst [vmem:[%s2050_s8 + $0xb8] sm:$0xff] %v1336_v30  ;;  %v1297_v39 = vadd.f32 %v2272_v53, %v1245_v31  ;;  %v1298_v40 = vadd.f32 %v2276_v55, %v1246_v32  ;;  %v1299_v41 = vadd.f32 %v2272_v53, %v1247_v33 }
 0x1d6   : > { %v1300_v42 = vadd.f32 %v2276_v55, %v1248_v34  ;;  %v1301_v46 = vadd.f32 %v2272_v53, %v1249_v35  ;;  %v1302_v47 = vadd.f32 %v2276_v55, %v1250_v36  ;;  %v1303_v48 = vadd.f32 %v2272_v53, %v1251_v37 }
 0x1d7   : > { %v1304_v49 = vadd.f32 %v2276_v55, %v1252_v38  ;;  %v1337_v57 = vmax.f32 %v1297_v39, 0.0  ;;  %v1338_v58 = vmax.f32 %v1298_v40, 0.0  ;;  %v1339_v59 = vmax.f32 %v1299_v41, 0.0 }
 0x1d8   : > { %v1340_v60 = vmax.f32 %v1300_v42, 0.0  ;;  %v1341_v63 = vmax.f32 %v1301_v46, 0.0  ;;  %v1342_v0 = vmax.f32 %v1302_v47, 0.0  ;;  %v1343_v1 = vmax.f32 %v1303_v48, 0.0 }
 0x1d9   : > { %v1344_v2 = vmax.f32 %v1304_v49, 0.0  ;;  %1377 = vst [vmem:[%s2050_s8 + $0xc0] sm:$0xff] %v1337_v57  ;;  %1378 = vst [vmem:[%s2050_s8 + $0xc8] sm:$0xff] %v1338_v58  ;;  %v1253_v3 = vmul.f32 %v2270_v52, %v1201_v43  ;;  %v1254_v4 = vmul.f32 %v2274_v54, %v1202_v44  ;;  %v1255_v5 = vmul.f32 %v2270_v52, %v1203_v45 }
 0x1da   : > { %1379 = vst [vmem:[%s2050_s8 + $0xd0] sm:$0xff] %v1339_v59  ;;  %1380 = vst [vmem:[%s2050_s8 + $0xd8] sm:$0xff] %v1340_v60  ;;  %v1256_v6 = vmul.f32 %v2274_v54, %v1204_v50  ;;  %v1257_v7 = vmul.f32 %v2270_v52, %v1205_v51  ;;  %v1258_v8 = vmul.f32 %v2274_v54, %v1206_v56 }
 0x1db   : > { %1381 = vst [vmem:[%s2050_s8 + $0xe0] sm:$0xff] %v1341_v63  ;;  %1382 = vst [vmem:[%s2050_s8 + $0xe8] sm:$0xff] %v1342_v0  ;;  %v1259_v9 = vmul.f32 %v2270_v52, %v1207_v61  ;;  %v1260_v10 = vmul.f32 %v2274_v54, %v1208_v62  ;;  %v1305_v11 = vadd.f32 %v2272_v53, %v1253_v3 }
 0x1dc   : > { %1383 = vst [vmem:[%s2050_s8 + $0xf0] sm:$0xff] %v1343_v1  ;;  %1384 = vst [vmem:[%s2050_s8 + $0xf8] sm:$0xff] %v1344_v2  ;;  %v1306_v12 = vadd.f32 %v2276_v55, %v1254_v4  ;;  %v1307_v13 = vadd.f32 %v2272_v53, %v1255_v5  ;;  %v1308_v14 = vadd.f32 %v2276_v55, %v1256_v6 }
 0x1dd   : > { %v1309_v15 = vadd.f32 %v2272_v53, %v1257_v7  ;;  %v1310_v16 = vadd.f32 %v2276_v55, %v1258_v8  ;;  %v1311_v52 = vadd.f32 %v2272_v53, %v1259_v9  ;;  %v1312_v54 = vadd.f32 %v2276_v55, %v1260_v10 }
 0x1de   : > { %v1345_v17 = vmax.f32 %v1305_v11, 0.0  ;;  %v1346_v18 = vmax.f32 %v1306_v12, 0.0  ;;  %v1347_v19 = vmax.f32 %v1307_v13, 0.0  ;;  %v1348_v20 = vmax.f32 %v1308_v14, 0.0 }
 0x1df   : > { %v1349_v21 = vmax.f32 %v1309_v15, 0.0  ;;  %v1350_v22 = vmax.f32 %v1310_v16, 0.0  ;;  %v1351_v23 = vmax.f32 %v1311_v52, 0.0  ;;  %v1352_v24 = vmax.f32 %v1312_v54, 0.0 }
 0x1e0   : > { %1385 = vst [vmem:[%s2050_s8 + $0x100] sm:$0xff] %v1345_v17  ;;  %1386 = vst [vmem:[%s2050_s8 + $0x108] sm:$0xff] %v1346_v18 }
 0x1e1   : > { %1387 = vst [vmem:[%s2050_s8 + $0x110] sm:$0xff] %v1347_v19  ;;  %1388 = vst [vmem:[%s2050_s8 + $0x118] sm:$0xff] %v1348_v20 }
 0x1e2   : > { %1389 = vst [vmem:[%s2050_s8 + $0x120] sm:$0xff] %v1349_v21  ;;  %1390 = vst [vmem:[%s2050_s8 + $0x128] sm:$0xff] %v1350_v22 }
 0x1e3   : > { %1391 = vst [vmem:[%s2050_s8 + $0x130] sm:$0xff] %v1351_v23  ;;  %1392 = vst [vmem:[%s2050_s8 + $0x138] sm:$0xff] %v1352_v24 }
 0x1e4 PF: > { %s14_s21 = sadd.s32 1, %s1785_s21   ;;  %s2424_s15 = smov %s1765_s16 }
 0x1e5   : > { %p11_p0 = scmp.ge.s32.totalorder %s14_s21, 8   ;;  %s2425_s16 = smov %s1864_s28 }
 0x1e6   : > { %s2426_s17 = smov %s1777_s19  ;;  %s2427_s18 = smov %s1781_s20 }
 0x1e7   : > { %s2428_s19 = smov %s2431_s22  ;;  %s2429_s20 = smov %s2435_s23 }
 0x1e8   :  { %13 = sbr.rel (!%p11_p0) target bundleno = 4 (0x4), region = 105 }

</bundles_post_ra>
